<compile_context>
chip_gen: v7x
topology: tpu7x:2x2x1
jax: 0.10.0
libtpu: 0.0.40
codegen_flags: <defaults>
</compile_context>

<pallas_src>
import jax
import jax.numpy as jnp
from jax.experimental import pallas as pl
from jax.experimental.pallas import tpu as pltpu

EMBED_DIM = 300
HIDDEN = 150


def _round_up(x, m):
    return (x + m - 1) // m * m


def _make_kernel(TB, L, inv_L):
    """Kernel closure over static tile sizes."""

    def kernel(tok_ref,                                    # scalar-prefetch (SMEM): [B_PAD*L] int32 (flat)
               emb_hbm,                                    # HBM (pl.ANY):           [V, D_PAD] f32
               w1_ref, b1_ref, w2_ref, b2_ref, w3_ref, b3_ref,   # VMEM weight blocks
               out_ref,                                    # VMEM out block:         [TB, O_PAD]
               gbuf, gsem, acc_ref):                       # scratch
        b_tile = pl.program_id(0)
        base = b_tile * (TB * L)                           # flat token offset of this batch tile

        def start_row(flat_base, slot):
            # Issue all L per-token row gathers for one batch row at once so
            # the DMA engine overlaps their latency.
            for t in range(L):
                tok = tok_ref[flat_base + t]
                pltpu.make_async_copy(
                    emb_hbm.at[pl.ds(tok, 1), :],
                    gbuf.at[slot, pl.ds(t, 1), :],
                    gsem.at[slot, t],
                ).start()

        def wait_row(slot):
            for t in range(L):
                pltpu.make_async_copy(
                    emb_hbm.at[pl.ds(0, 1), :],
                    gbuf.at[slot, pl.ds(t, 1), :],
                    gsem.at[slot, t],
                ).wait()

        # Prime the pipeline with the first batch row of this tile.
        start_row(base, 0)

        @pl.loop(0, TB)
        def _(r):
            slot = r & 1

            # Prefetch the next batch row into the other buffer slot while we
            # reduce the current one.
            @pl.when(r + 1 < TB)
            def _():
                start_row(base + (r + 1) * L, 1 - slot)

            wait_row(slot)
            # Row sum over the L gathered embedding rows (sublane reduce).
            acc_ref[pl.ds(r, 1), :] = jnp.sum(gbuf[slot], axis=0, keepdims=True)

        # MLP head on the mean-pooled embeddings (padded, MXU-friendly dims).
        x = acc_ref[...] * inv_L                                      # mean, once per tile
        h1 = jnp.dot(x, w1_ref[...], preferred_element_type=jnp.float32) + b1_ref[...]
        h1 = jnp.maximum(h1, 0.0)
        h2 = jnp.dot(h1, w2_ref[...], preferred_element_type=jnp.float32) + b2_ref[...]
        h2 = jnp.maximum(h2, 0.0)
        out = jnp.dot(h2, w3_ref[...], preferred_element_type=jnp.float32) + b3_ref[...]
        out_ref[...] = out.astype(out_ref.dtype)                      # lane-dense [TB, 128]

    return kernel


def baseline_model_forward(token_ids, emb_table, w1, b1, w2, b2, w3, b3):
    """token_ids: [B, L] int32; returns [B, 1] f32."""
    B, L = token_ids.shape
    V, D = emb_table.shape
    H = w1.shape[1]
    O = w3.shape[1]

    f32 = jnp.float32
    D_PAD = _round_up(D, 128)          # 300 -> 384
    H_PAD = _round_up(H, 128)          # 150 -> 256
    O_PAD = _round_up(O, 128)          # 1   -> 128
    TB = min(128, _round_up(B, 8))     # batch tile (sublane-aligned)
    B_PAD = _round_up(B, TB)

    # Zero-pad operands to lane/MXU-friendly shapes (padding is numerically
    # inert: padded bias entries are 0, so ReLU keeps padded channels at 0).
    emb_p = jnp.zeros((V, D_PAD), f32).at[:, :D].set(emb_table.astype(f32))
    w1_p = jnp.zeros((D_PAD, H_PAD), f32).at[:D, :H].set(w1.astype(f32))
    b1_p = jnp.zeros((1, H_PAD), f32).at[:, :H].set(b1.astype(f32))
    w2_p = jnp.zeros((H_PAD, H_PAD), f32).at[:H, :H].set(w2.astype(f32))
    b2_p = jnp.zeros((1, H_PAD), f32).at[:, :H].set(b2.astype(f32))
    w3_p = jnp.zeros((H_PAD, O_PAD), f32).at[:H, :O].set(w3.astype(f32))
    b3_p = jnp.zeros((1, O_PAD), f32).at[:, :O].set(b3.astype(f32))
    # Flat 1-D token-id array (1-D SMEM avoids 2-D SMEM lane padding blowup).
    tok_p = (jnp.zeros((B_PAD, L), jnp.int32)
             .at[:B, :].set(token_ids.astype(jnp.int32))
             .reshape(B_PAD * L))

    kernel = _make_kernel(TB, L, 1.0 / L)
    const_map = lambda b, tok: (0, 0)   # weights stay resident across batch tiles

    out = pl.pallas_call(
        kernel,
        out_shape=jax.ShapeDtypeStruct((B_PAD, O_PAD), f32),
        grid_spec=pltpu.PrefetchScalarGridSpec(
            num_scalar_prefetch=1,                     # token ids -> SMEM
            grid=(B_PAD // TB,),
            in_specs=[
                pl.BlockSpec(memory_space=pl.ANY),     # embedding table stays in HBM
                pl.BlockSpec((D_PAD, H_PAD), const_map),
                pl.BlockSpec((1, H_PAD), const_map),
                pl.BlockSpec((H_PAD, H_PAD), const_map),
                pl.BlockSpec((1, H_PAD), const_map),
                pl.BlockSpec((H_PAD, O_PAD), const_map),
                pl.BlockSpec((1, O_PAD), const_map),
            ],
            out_specs=pl.BlockSpec((TB, O_PAD), lambda b, tok: (b, 0)),
            scratch_shapes=[
                pltpu.VMEM((2, L, D_PAD), f32),        # double-buffered gathered rows
                pltpu.SemaphoreType.DMA((2, L)),       # one sem per in-flight row DMA
                pltpu.VMEM((TB, D_PAD), f32),          # mean-pool accumulator
            ],
        ),
        compiler_params=pltpu.CompilerParams(
            dimension_semantics=("parallel",),         # batch tiles -> both TCs on v7x
            vmem_limit_bytes=32 * 1024 * 1024,         # fits all generations (v7x: 64 MiB phys)
        ),
    )(tok_p, emb_p, w1_p, b1_p, w2_p, b2_p, w3_p, b3_p)

    return out[:B, :1]


def init_params(key, vocab_size):
    """Deterministic parameter init (PyTorch-Linear-like uniform ranges)."""
    ks = jax.random.split(key, 7)

    def lin(kw, kb, fan_in, fan_out):
        bound = 1.0 / (fan_in ** 0.5)
        w = jax.random.uniform(kw, (fan_in, fan_out), jnp.float32, -bound, bound)
        b = jax.random.uniform(kb, (1, fan_out), jnp.float32, -bound, bound)
        return w, b

    emb_table = jax.random.normal(ks[0], (vocab_size, EMBED_DIM), jnp.float32)
    w1, b1 = lin(ks[1], ks[2], EMBED_DIM, HIDDEN)
    w2, b2 = lin(ks[3], ks[4], HIDDEN, HIDDEN)
    w3, b3 = lin(ks[5], ks[6], HIDDEN, 1)
    return emb_table, w1, b1, w2, b2, w3, b3


def reference_forward(token_ids, emb_table, w1, b1, w2, b2, w3, b3):
    emb = jnp.take(emb_table, token_ids, axis=0)
    x = jnp.mean(emb, axis=1)
    x = jax.nn.relu(x @ w1 + b1)
    x = jax.nn.relu(x @ w2 + b2)
    return x @ w3 + b3


if __name__ == "__main__":
    B, L, V = 2, 8, 32
    key = jax.random.PRNGKey(0)
    k_tok, k_par = jax.random.split(key)

    token_ids = jax.random.randint(k_tok, (B, L), 0, V, dtype=jnp.int32)
    params = init_params(k_par, V)

    out = jax.block_until_ready(baseline_model_forward(token_ids, *params))
    ref = reference_forward(token_ids, *params)

    assert out.shape == (B, 1), out.shape
    assert jnp.allclose(out, ref, atol=2e-4, rtol=2e-4), (out, ref)

    print("KERNEL_OK")
</pallas_src>

<mosaic_0001>
module attributes {stable_mosaic.version = 11 : i64} {
  func.func @kernel(%arg0: i32, %arg1: memref<64xi32, #tpu.memory_space<smem>>, %arg2: memref<32x384xf32, #tpu.memory_space<any>>, %arg3: memref<384x256xf32, #tpu.memory_space<vmem>>, %arg4: memref<1x256xf32, #tpu.memory_space<vmem>>, %arg5: memref<256x256xf32, #tpu.memory_space<vmem>>, %arg6: memref<1x256xf32, #tpu.memory_space<vmem>>, %arg7: memref<256x128xf32, #tpu.memory_space<vmem>>, %arg8: memref<1x128xf32, #tpu.memory_space<vmem>>, %arg9: memref<8x128xf32, #tpu.memory_space<vmem>>, %arg10: memref<2x8x384xf32, #tpu.memory_space<vmem>>, %arg11: memref<2x8x!tpu.dma_semaphore, #tpu.memory_space<semaphore_mem>>, %arg12: memref<8x384xf32, #tpu.memory_space<vmem>>) attributes {dimension_semantics = [#tpu.dimension_semantics<parallel>], iteration_bounds = array<i64: 1>, scalar_prefetch = 1 : i64, scratch_operands = 3 : i64, tpu.core_type = #tpu.core_type<tc>, window_params = [{}, {pipeline_mode = #tpu.pipeline_mode<synchronous>, transform_indices = @transform_1, window_bounds = array<i64: 384, 256>}, {pipeline_mode = #tpu.pipeline_mode<synchronous>, transform_indices = @transform_2, window_bounds = array<i64: 1, 256>}, {pipeline_mode = #tpu.pipeline_mode<synchronous>, transform_indices = @transform_3, window_bounds = array<i64: 256, 256>}, {pipeline_mode = #tpu.pipeline_mode<synchronous>, transform_indices = @transform_4, window_bounds = array<i64: 1, 256>}, {pipeline_mode = #tpu.pipeline_mode<synchronous>, transform_indices = @transform_5, window_bounds = array<i64: 256, 128>}, {pipeline_mode = #tpu.pipeline_mode<synchronous>, transform_indices = @transform_6, window_bounds = array<i64: 1, 128>}, {transform_indices = @transform_7, window_bounds = array<i64: 8, 128>}]} {
    %c64_i32 = arith.constant 64 : i32
    %0 = arith.muli %arg0, %c64_i32 : i32
    %c0_i32 = arith.constant 0 : i32
    %1 = arith.addi %0, %c0_i32 : i32
    %2 = arith.index_cast %1 : i32 to index
    %3 = memref.load %arg1[%2] : memref<64xi32, #tpu.memory_space<smem>>
    %c0_i32_0 = arith.constant 0 : i32
    %c0_i32_1 = arith.constant 0 : i32
    %c0_i32_2 = arith.constant 0 : i32
    %c0_i32_3 = arith.constant 0 : i32
    %4 = tpu.memref_slice %arg2[%3, %c0_i32_3] : memref<32x384xf32, #tpu.memory_space<any>> -> memref<1x384xf32, #tpu.memory_space<any>>
    %c0_i32_4 = arith.constant 0 : i32
    %c0_i32_5 = arith.constant 0 : i32
    %5 = tpu.memref_slice %arg10[%c0_i32_0, %c0_i32_4, %c0_i32_5] : memref<2x8x384xf32, #tpu.memory_space<vmem>> -> memref<1x1x384xf32, #tpu.memory_space<vmem>>
    %6 = tpu.memref_squeeze %5 : memref<1x1x384xf32, #tpu.memory_space<vmem>> -> memref<1x384xf32, #tpu.memory_space<vmem>>
    %7 = tpu.memref_slice %arg11[%c0_i32_1, %c0_i32_2] : memref<2x8x!tpu.dma_semaphore, #tpu.memory_space<semaphore_mem>> -> memref<1x1x!tpu.dma_semaphore, #tpu.memory_space<semaphore_mem>>
    %8 = tpu.memref_squeeze %7 : memref<1x1x!tpu.dma_semaphore, #tpu.memory_space<semaphore_mem>> -> memref<!tpu.dma_semaphore, #tpu.memory_space<semaphore_mem>>
    tpu.enqueue_dma source(%4 : memref<1x384xf32, #tpu.memory_space<any>>) target(%6 : memref<1x384xf32, #tpu.memory_space<vmem>>) target_semaphore(%8 : memref<!tpu.dma_semaphore, #tpu.memory_space<semaphore_mem>>)
    %c1_i32 = arith.constant 1 : i32
    %9 = arith.addi %0, %c1_i32 : i32
    %10 = arith.index_cast %9 : i32 to index
    %11 = memref.load %arg1[%10] : memref<64xi32, #tpu.memory_space<smem>>
    %c0_i32_6 = arith.constant 0 : i32
    %c0_i32_7 = arith.constant 0 : i32
    %c1_i32_8 = arith.constant 1 : i32
    %c0_i32_9 = arith.constant 0 : i32
    %12 = tpu.memref_slice %arg2[%11, %c0_i32_9] : memref<32x384xf32, #tpu.memory_space<any>> -> memref<1x384xf32, #tpu.memory_space<any>>
    %c1_i32_10 = arith.constant 1 : i32
    %c0_i32_11 = arith.constant 0 : i32
    %13 = tpu.memref_slice %arg10[%c0_i32_6, %c1_i32_10, %c0_i32_11] : memref<2x8x384xf32, #tpu.memory_space<vmem>> -> memref<1x1x384xf32, #tpu.memory_space<vmem>>
    %14 = tpu.memref_squeeze %13 : memref<1x1x384xf32, #tpu.memory_space<vmem>> -> memref<1x384xf32, #tpu.memory_space<vmem>>
    %15 = tpu.memref_slice %arg11[%c0_i32_7, %c1_i32_8] : memref<2x8x!tpu.dma_semaphore, #tpu.memory_space<semaphore_mem>> -> memref<1x1x!tpu.dma_semaphore, #tpu.memory_space<semaphore_mem>>
    %16 = tpu.memref_squeeze %15 : memref<1x1x!tpu.dma_semaphore, #tpu.memory_space<semaphore_mem>> -> memref<!tpu.dma_semaphore, #tpu.memory_space<semaphore_mem>>
    tpu.enqueue_dma source(%12 : memref<1x384xf32, #tpu.memory_space<any>>) target(%14 : memref<1x384xf32, #tpu.memory_space<vmem>>) target_semaphore(%16 : memref<!tpu.dma_semaphore, #tpu.memory_space<semaphore_mem>>)
    %c2_i32 = arith.constant 2 : i32
    %17 = arith.addi %0, %c2_i32 : i32
    %18 = arith.index_cast %17 : i32 to index
    %19 = memref.load %arg1[%18] : memref<64xi32, #tpu.memory_space<smem>>
    %c0_i32_12 = arith.constant 0 : i32
    %c0_i32_13 = arith.constant 0 : i32
    %c2_i32_14 = arith.constant 2 : i32
    %c0_i32_15 = arith.constant 0 : i32
    %20 = tpu.memref_slice %arg2[%19, %c0_i32_15] : memref<32x384xf32, #tpu.memory_space<any>> -> memref<1x384xf32, #tpu.memory_space<any>>
    %c2_i32_16 = arith.constant 2 : i32
    %c0_i32_17 = arith.constant 0 : i32
    %21 = tpu.memref_slice %arg10[%c0_i32_12, %c2_i32_16, %c0_i32_17] : memref<2x8x384xf32, #tpu.memory_space<vmem>> -> memref<1x1x384xf32, #tpu.memory_space<vmem>>
    %22 = tpu.memref_squeeze %21 : memref<1x1x384xf32, #tpu.memory_space<vmem>> -> memref<1x384xf32, #tpu.memory_space<vmem>>
    %23 = tpu.memref_slice %arg11[%c0_i32_13, %c2_i32_14] : memref<2x8x!tpu.dma_semaphore, #tpu.memory_space<semaphore_mem>> -> memref<1x1x!tpu.dma_semaphore, #tpu.memory_space<semaphore_mem>>
    %24 = tpu.memref_squeeze %23 : memref<1x1x!tpu.dma_semaphore, #tpu.memory_space<semaphore_mem>> -> memref<!tpu.dma_semaphore, #tpu.memory_space<semaphore_mem>>
    tpu.enqueue_dma source(%20 : memref<1x384xf32, #tpu.memory_space<any>>) target(%22 : memref<1x384xf32, #tpu.memory_space<vmem>>) target_semaphore(%24 : memref<!tpu.dma_semaphore, #tpu.memory_space<semaphore_mem>>)
    %c3_i32 = arith.constant 3 : i32
    %25 = arith.addi %0, %c3_i32 : i32
    %26 = arith.index_cast %25 : i32 to index
    %27 = memref.load %arg1[%26] : memref<64xi32, #tpu.memory_space<smem>>
    %c0_i32_18 = arith.constant 0 : i32
    %c0_i32_19 = arith.constant 0 : i32
    %c3_i32_20 = arith.constant 3 : i32
    %c0_i32_21 = arith.constant 0 : i32
    %28 = tpu.memref_slice %arg2[%27, %c0_i32_21] : memref<32x384xf32, #tpu.memory_space<any>> -> memref<1x384xf32, #tpu.memory_space<any>>
    %c3_i32_22 = arith.constant 3 : i32
    %c0_i32_23 = arith.constant 0 : i32
    %29 = tpu.memref_slice %arg10[%c0_i32_18, %c3_i32_22, %c0_i32_23] : memref<2x8x384xf32, #tpu.memory_space<vmem>> -> memref<1x1x384xf32, #tpu.memory_space<vmem>>
    %30 = tpu.memref_squeeze %29 : memref<1x1x384xf32, #tpu.memory_space<vmem>> -> memref<1x384xf32, #tpu.memory_space<vmem>>
    %31 = tpu.memref_slice %arg11[%c0_i32_19, %c3_i32_20] : memref<2x8x!tpu.dma_semaphore, #tpu.memory_space<semaphore_mem>> -> memref<1x1x!tpu.dma_semaphore, #tpu.memory_space<semaphore_mem>>
    %32 = tpu.memref_squeeze %31 : memref<1x1x!tpu.dma_semaphore, #tpu.memory_space<semaphore_mem>> -> memref<!tpu.dma_semaphore, #tpu.memory_space<semaphore_mem>>
    tpu.enqueue_dma source(%28 : memref<1x384xf32, #tpu.memory_space<any>>) target(%30 : memref<1x384xf32, #tpu.memory_space<vmem>>) target_semaphore(%32 : memref<!tpu.dma_semaphore, #tpu.memory_space<semaphore_mem>>)
    %c4_i32 = arith.constant 4 : i32
    %33 = arith.addi %0, %c4_i32 : i32
    %34 = arith.index_cast %33 : i32 to index
    %35 = memref.load %arg1[%34] : memref<64xi32, #tpu.memory_space<smem>>
    %c0_i32_24 = arith.constant 0 : i32
    %c0_i32_25 = arith.constant 0 : i32
    %c4_i32_26 = arith.constant 4 : i32
    %c0_i32_27 = arith.constant 0 : i32
    %36 = tpu.memref_slice %arg2[%35, %c0_i32_27] : memref<32x384xf32, #tpu.memory_space<any>> -> memref<1x384xf32, #tpu.memory_space<any>>
    %c4_i32_28 = arith.constant 4 : i32
    %c0_i32_29 = arith.constant 0 : i32
    %37 = tpu.memref_slice %arg10[%c0_i32_24, %c4_i32_28, %c0_i32_29] : memref<2x8x384xf32, #tpu.memory_space<vmem>> -> memref<1x1x384xf32, #tpu.memory_space<vmem>>
    %38 = tpu.memref_squeeze %37 : memref<1x1x384xf32, #tpu.memory_space<vmem>> -> memref<1x384xf32, #tpu.memory_space<vmem>>
    %39 = tpu.memref_slice %arg11[%c0_i32_25, %c4_i32_26] : memref<2x8x!tpu.dma_semaphore, #tpu.memory_space<semaphore_mem>> -> memref<1x1x!tpu.dma_semaphore, #tpu.memory_space<semaphore_mem>>
    %40 = tpu.memref_squeeze %39 : memref<1x1x!tpu.dma_semaphore, #tpu.memory_space<semaphore_mem>> -> memref<!tpu.dma_semaphore, #tpu.memory_space<semaphore_mem>>
    tpu.enqueue_dma source(%36 : memref<1x384xf32, #tpu.memory_space<any>>) target(%38 : memref<1x384xf32, #tpu.memory_space<vmem>>) target_semaphore(%40 : memref<!tpu.dma_semaphore, #tpu.memory_space<semaphore_mem>>)
    %c5_i32 = arith.constant 5 : i32
    %41 = arith.addi %0, %c5_i32 : i32
    %42 = arith.index_cast %41 : i32 to index
    %43 = memref.load %arg1[%42] : memref<64xi32, #tpu.memory_space<smem>>
    %c0_i32_30 = arith.constant 0 : i32
    %c0_i32_31 = arith.constant 0 : i32
    %c5_i32_32 = arith.constant 5 : i32
    %c0_i32_33 = arith.constant 0 : i32
    %44 = tpu.memref_slice %arg2[%43, %c0_i32_33] : memref<32x384xf32, #tpu.memory_space<any>> -> memref<1x384xf32, #tpu.memory_space<any>>
    %c5_i32_34 = arith.constant 5 : i32
    %c0_i32_35 = arith.constant 0 : i32
    %45 = tpu.memref_slice %arg10[%c0_i32_30, %c5_i32_34, %c0_i32_35] : memref<2x8x384xf32, #tpu.memory_space<vmem>> -> memref<1x1x384xf32, #tpu.memory_space<vmem>>
    %46 = tpu.memref_squeeze %45 : memref<1x1x384xf32, #tpu.memory_space<vmem>> -> memref<1x384xf32, #tpu.memory_space<vmem>>
    %47 = tpu.memref_slice %arg11[%c0_i32_31, %c5_i32_32] : memref<2x8x!tpu.dma_semaphore, #tpu.memory_space<semaphore_mem>> -> memref<1x1x!tpu.dma_semaphore, #tpu.memory_space<semaphore_mem>>
    %48 = tpu.memref_squeeze %47 : memref<1x1x!tpu.dma_semaphore, #tpu.memory_space<semaphore_mem>> -> memref<!tpu.dma_semaphore, #tpu.memory_space<semaphore_mem>>
    tpu.enqueue_dma source(%44 : memref<1x384xf32, #tpu.memory_space<any>>) target(%46 : memref<1x384xf32, #tpu.memory_space<vmem>>) target_semaphore(%48 : memref<!tpu.dma_semaphore, #tpu.memory_space<semaphore_mem>>)
    %c6_i32 = arith.constant 6 : i32
    %49 = arith.addi %0, %c6_i32 : i32
    %50 = arith.index_cast %49 : i32 to index
    %51 = memref.load %arg1[%50] : memref<64xi32, #tpu.memory_space<smem>>
    %c0_i32_36 = arith.constant 0 : i32
    %c0_i32_37 = arith.constant 0 : i32
    %c6_i32_38 = arith.constant 6 : i32
    %c0_i32_39 = arith.constant 0 : i32
    %52 = tpu.memref_slice %arg2[%51, %c0_i32_39] : memref<32x384xf32, #tpu.memory_space<any>> -> memref<1x384xf32, #tpu.memory_space<any>>
    %c6_i32_40 = arith.constant 6 : i32
    %c0_i32_41 = arith.constant 0 : i32
    %53 = tpu.memref_slice %arg10[%c0_i32_36, %c6_i32_40, %c0_i32_41] : memref<2x8x384xf32, #tpu.memory_space<vmem>> -> memref<1x1x384xf32, #tpu.memory_space<vmem>>
    %54 = tpu.memref_squeeze %53 : memref<1x1x384xf32, #tpu.memory_space<vmem>> -> memref<1x384xf32, #tpu.memory_space<vmem>>
    %55 = tpu.memref_slice %arg11[%c0_i32_37, %c6_i32_38] : memref<2x8x!tpu.dma_semaphore, #tpu.memory_space<semaphore_mem>> -> memref<1x1x!tpu.dma_semaphore, #tpu.memory_space<semaphore_mem>>
    %56 = tpu.memref_squeeze %55 : memref<1x1x!tpu.dma_semaphore, #tpu.memory_space<semaphore_mem>> -> memref<!tpu.dma_semaphore, #tpu.memory_space<semaphore_mem>>
    tpu.enqueue_dma source(%52 : memref<1x384xf32, #tpu.memory_space<any>>) target(%54 : memref<1x384xf32, #tpu.memory_space<vmem>>) target_semaphore(%56 : memref<!tpu.dma_semaphore, #tpu.memory_space<semaphore_mem>>)
    %c7_i32 = arith.constant 7 : i32
    %57 = arith.addi %0, %c7_i32 : i32
    %58 = arith.index_cast %57 : i32 to index
    %59 = memref.load %arg1[%58] : memref<64xi32, #tpu.memory_space<smem>>
    %c0_i32_42 = arith.constant 0 : i32
    %c0_i32_43 = arith.constant 0 : i32
    %c7_i32_44 = arith.constant 7 : i32
    %c0_i32_45 = arith.constant 0 : i32
    %60 = tpu.memref_slice %arg2[%59, %c0_i32_45] : memref<32x384xf32, #tpu.memory_space<any>> -> memref<1x384xf32, #tpu.memory_space<any>>
    %c7_i32_46 = arith.constant 7 : i32
    %c0_i32_47 = arith.constant 0 : i32
    %61 = tpu.memref_slice %arg10[%c0_i32_42, %c7_i32_46, %c0_i32_47] : memref<2x8x384xf32, #tpu.memory_space<vmem>> -> memref<1x1x384xf32, #tpu.memory_space<vmem>>
    %62 = tpu.memref_squeeze %61 : memref<1x1x384xf32, #tpu.memory_space<vmem>> -> memref<1x384xf32, #tpu.memory_space<vmem>>
    %63 = tpu.memref_slice %arg11[%c0_i32_43, %c7_i32_44] : memref<2x8x!tpu.dma_semaphore, #tpu.memory_space<semaphore_mem>> -> memref<1x1x!tpu.dma_semaphore, #tpu.memory_space<semaphore_mem>>
    %64 = tpu.memref_squeeze %63 : memref<1x1x!tpu.dma_semaphore, #tpu.memory_space<semaphore_mem>> -> memref<!tpu.dma_semaphore, #tpu.memory_space<semaphore_mem>>
    tpu.enqueue_dma source(%60 : memref<1x384xf32, #tpu.memory_space<any>>) target(%62 : memref<1x384xf32, #tpu.memory_space<vmem>>) target_semaphore(%64 : memref<!tpu.dma_semaphore, #tpu.memory_space<semaphore_mem>>)
    %c0_i32_48 = arith.constant 0 : i32
    %c8_i32 = arith.constant 8 : i32
    %65 = arith.addi %c0_i32_48, %c8_i32 : i32
    %c1_i32_49 = arith.constant 1 : i32
    scf.for %arg13 = %c0_i32_48 to %65 step %c1_i32_49  : i32 {
      %c1_i32_71 = arith.constant 1 : i32
      %89 = arith.muli %arg13, %c1_i32_71 : i32
      %c0_i32_72 = arith.constant 0 : i32
      %90 = arith.addi %c0_i32_72, %89 : i32
      %c1_i32_73 = arith.constant 1 : i32
      %91 = arith.andi %90, %c1_i32_73 : i32
      %c1_i32_74 = arith.constant 1 : i32
      %92 = arith.addi %90, %c1_i32_74 : i32
      %c8_i32_75 = arith.constant 8 : i32
      %93 = arith.cmpi slt, %92, %c8_i32_75 : i32
      %94 = arith.extui %93 : i1 to i32
      %c0_i32_76 = arith.constant 0 : i32
      %95 = arith.cmpi ne, %94, %c0_i32_76 : i32
      scf.if %95 {
        %c1_i32_121 = arith.constant 1 : i32
        %143 = arith.addi %90, %c1_i32_121 : i32
        %c8_i32_122 = arith.constant 8 : i32
        %144 = arith.muli %143, %c8_i32_122 : i32
        %145 = arith.addi %0, %144 : i32
        %c1_i32_123 = arith.constant 1 : i32
        %146 = arith.subi %c1_i32_123, %91 : i32
        %c0_i32_124 = arith.constant 0 : i32
        %147 = arith.addi %145, %c0_i32_124 : i32
        %148 = arith.index_cast %147 : i32 to index
        %149 = memref.load %arg1[%148] : memref<64xi32, #tpu.memory_space<smem>>
        %c0_i32_125 = arith.constant 0 : i32
        %c0_i32_126 = arith.constant 0 : i32
        %150 = tpu.memref_slice %arg2[%149, %c0_i32_126] : memref<32x384xf32, #tpu.memory_space<any>> -> memref<1x384xf32, #tpu.memory_space<any>>
        %c0_i32_127 = arith.constant 0 : i32
        %c0_i32_128 = arith.constant 0 : i32
        %151 = tpu.memref_slice %arg10[%146, %c0_i32_127, %c0_i32_128] : memref<2x8x384xf32, #tpu.memory_space<vmem>> -> memref<1x1x384xf32, #tpu.memory_space<vmem>>
        %152 = tpu.memref_squeeze %151 : memref<1x1x384xf32, #tpu.memory_space<vmem>> -> memref<1x384xf32, #tpu.memory_space<vmem>>
        %153 = tpu.memref_slice %arg11[%146, %c0_i32_125] : memref<2x8x!tpu.dma_semaphore, #tpu.memory_space<semaphore_mem>> -> memref<1x1x!tpu.dma_semaphore, #tpu.memory_space<semaphore_mem>>
        %154 = tpu.memref_squeeze %153 : memref<1x1x!tpu.dma_semaphore, #tpu.memory_space<semaphore_mem>> -> memref<!tpu.dma_semaphore, #tpu.memory_space<semaphore_mem>>
        tpu.enqueue_dma source(%150 : memref<1x384xf32, #tpu.memory_space<any>>) target(%152 : memref<1x384xf32, #tpu.memory_space<vmem>>) target_semaphore(%154 : memref<!tpu.dma_semaphore, #tpu.memory_space<semaphore_mem>>)
        %c1_i32_129 = arith.constant 1 : i32
        %155 = arith.addi %145, %c1_i32_129 : i32
        %156 = arith.index_cast %155 : i32 to index
        %157 = memref.load %arg1[%156] : memref<64xi32, #tpu.memory_space<smem>>
        %c1_i32_130 = arith.constant 1 : i32
        %c0_i32_131 = arith.constant 0 : i32
        %158 = tpu.memref_slice %arg2[%157, %c0_i32_131] : memref<32x384xf32, #tpu.memory_space<any>> -> memref<1x384xf32, #tpu.memory_space<any>>
        %c1_i32_132 = arith.constant 1 : i32
        %c0_i32_133 = arith.constant 0 : i32
        %159 = tpu.memref_slice %arg10[%146, %c1_i32_132, %c0_i32_133] : memref<2x8x384xf32, #tpu.memory_space<vmem>> -> memref<1x1x384xf32, #tpu.memory_space<vmem>>
        %160 = tpu.memref_squeeze %159 : memref<1x1x384xf32, #tpu.memory_space<vmem>> -> memref<1x384xf32, #tpu.memory_space<vmem>>
        %161 = tpu.memref_slice %arg11[%146, %c1_i32_130] : memref<2x8x!tpu.dma_semaphore, #tpu.memory_space<semaphore_mem>> -> memref<1x1x!tpu.dma_semaphore, #tpu.memory_space<semaphore_mem>>
        %162 = tpu.memref_squeeze %161 : memref<1x1x!tpu.dma_semaphore, #tpu.memory_space<semaphore_mem>> -> memref<!tpu.dma_semaphore, #tpu.memory_space<semaphore_mem>>
        tpu.enqueue_dma source(%158 : memref<1x384xf32, #tpu.memory_space<any>>) target(%160 : memref<1x384xf32, #tpu.memory_space<vmem>>) target_semaphore(%162 : memref<!tpu.dma_semaphore, #tpu.memory_space<semaphore_mem>>)
        %c2_i32_134 = arith.constant 2 : i32
        %163 = arith.addi %145, %c2_i32_134 : i32
        %164 = arith.index_cast %163 : i32 to index
        %165 = memref.load %arg1[%164] : memref<64xi32, #tpu.memory_space<smem>>
        %c2_i32_135 = arith.constant 2 : i32
        %c0_i32_136 = arith.constant 0 : i32
        %166 = tpu.memref_slice %arg2[%165, %c0_i32_136] : memref<32x384xf32, #tpu.memory_space<any>> -> memref<1x384xf32, #tpu.memory_space<any>>
        %c2_i32_137 = arith.constant 2 : i32
        %c0_i32_138 = arith.constant 0 : i32
        %167 = tpu.memref_slice %arg10[%146, %c2_i32_137, %c0_i32_138] : memref<2x8x384xf32, #tpu.memory_space<vmem>> -> memref<1x1x384xf32, #tpu.memory_space<vmem>>
        %168 = tpu.memref_squeeze %167 : memref<1x1x384xf32, #tpu.memory_space<vmem>> -> memref<1x384xf32, #tpu.memory_space<vmem>>
        %169 = tpu.memref_slice %arg11[%146, %c2_i32_135] : memref<2x8x!tpu.dma_semaphore, #tpu.memory_space<semaphore_mem>> -> memref<1x1x!tpu.dma_semaphore, #tpu.memory_space<semaphore_mem>>
        %170 = tpu.memref_squeeze %169 : memref<1x1x!tpu.dma_semaphore, #tpu.memory_space<semaphore_mem>> -> memref<!tpu.dma_semaphore, #tpu.memory_space<semaphore_mem>>
        tpu.enqueue_dma source(%166 : memref<1x384xf32, #tpu.memory_space<any>>) target(%168 : memref<1x384xf32, #tpu.memory_space<vmem>>) target_semaphore(%170 : memref<!tpu.dma_semaphore, #tpu.memory_space<semaphore_mem>>)
        %c3_i32_139 = arith.constant 3 : i32
        %171 = arith.addi %145, %c3_i32_139 : i32
        %172 = arith.index_cast %171 : i32 to index
        %173 = memref.load %arg1[%172] : memref<64xi32, #tpu.memory_space<smem>>
        %c3_i32_140 = arith.constant 3 : i32
        %c0_i32_141 = arith.constant 0 : i32
        %174 = tpu.memref_slice %arg2[%173, %c0_i32_141] : memref<32x384xf32, #tpu.memory_space<any>> -> memref<1x384xf32, #tpu.memory_space<any>>
        %c3_i32_142 = arith.constant 3 : i32
        %c0_i32_143 = arith.constant 0 : i32
        %175 = tpu.memref_slice %arg10[%146, %c3_i32_142, %c0_i32_143] : memref<2x8x384xf32, #tpu.memory_space<vmem>> -> memref<1x1x384xf32, #tpu.memory_space<vmem>>
        %176 = tpu.memref_squeeze %175 : memref<1x1x384xf32, #tpu.memory_space<vmem>> -> memref<1x384xf32, #tpu.memory_space<vmem>>
        %177 = tpu.memref_slice %arg11[%146, %c3_i32_140] : memref<2x8x!tpu.dma_semaphore, #tpu.memory_space<semaphore_mem>> -> memref<1x1x!tpu.dma_semaphore, #tpu.memory_space<semaphore_mem>>
        %178 = tpu.memref_squeeze %177 : memref<1x1x!tpu.dma_semaphore, #tpu.memory_space<semaphore_mem>> -> memref<!tpu.dma_semaphore, #tpu.memory_space<semaphore_mem>>
        tpu.enqueue_dma source(%174 : memref<1x384xf32, #tpu.memory_space<any>>) target(%176 : memref<1x384xf32, #tpu.memory_space<vmem>>) target_semaphore(%178 : memref<!tpu.dma_semaphore, #tpu.memory_space<semaphore_mem>>)
        %c4_i32_144 = arith.constant 4 : i32
        %179 = arith.addi %145, %c4_i32_144 : i32
        %180 = arith.index_cast %179 : i32 to index
        %181 = memref.load %arg1[%180] : memref<64xi32, #tpu.memory_space<smem>>
        %c4_i32_145 = arith.constant 4 : i32
        %c0_i32_146 = arith.constant 0 : i32
        %182 = tpu.memref_slice %arg2[%181, %c0_i32_146] : memref<32x384xf32, #tpu.memory_space<any>> -> memref<1x384xf32, #tpu.memory_space<any>>
        %c4_i32_147 = arith.constant 4 : i32
        %c0_i32_148 = arith.constant 0 : i32
        %183 = tpu.memref_slice %arg10[%146, %c4_i32_147, %c0_i32_148] : memref<2x8x384xf32, #tpu.memory_space<vmem>> -> memref<1x1x384xf32, #tpu.memory_space<vmem>>
        %184 = tpu.memref_squeeze %183 : memref<1x1x384xf32, #tpu.memory_space<vmem>> -> memref<1x384xf32, #tpu.memory_space<vmem>>
        %185 = tpu.memref_slice %arg11[%146, %c4_i32_145] : memref<2x8x!tpu.dma_semaphore, #tpu.memory_space<semaphore_mem>> -> memref<1x1x!tpu.dma_semaphore, #tpu.memory_space<semaphore_mem>>
        %186 = tpu.memref_squeeze %185 : memref<1x1x!tpu.dma_semaphore, #tpu.memory_space<semaphore_mem>> -> memref<!tpu.dma_semaphore, #tpu.memory_space<semaphore_mem>>
        tpu.enqueue_dma source(%182 : memref<1x384xf32, #tpu.memory_space<any>>) target(%184 : memref<1x384xf32, #tpu.memory_space<vmem>>) target_semaphore(%186 : memref<!tpu.dma_semaphore, #tpu.memory_space<semaphore_mem>>)
        %c5_i32_149 = arith.constant 5 : i32
        %187 = arith.addi %145, %c5_i32_149 : i32
        %188 = arith.index_cast %187 : i32 to index
        %189 = memref.load %arg1[%188] : memref<64xi32, #tpu.memory_space<smem>>
        %c5_i32_150 = arith.constant 5 : i32
        %c0_i32_151 = arith.constant 0 : i32
        %190 = tpu.memref_slice %arg2[%189, %c0_i32_151] : memref<32x384xf32, #tpu.memory_space<any>> -> memref<1x384xf32, #tpu.memory_space<any>>
        %c5_i32_152 = arith.constant 5 : i32
        %c0_i32_153 = arith.constant 0 : i32
        %191 = tpu.memref_slice %arg10[%146, %c5_i32_152, %c0_i32_153] : memref<2x8x384xf32, #tpu.memory_space<vmem>> -> memref<1x1x384xf32, #tpu.memory_space<vmem>>
        %192 = tpu.memref_squeeze %191 : memref<1x1x384xf32, #tpu.memory_space<vmem>> -> memref<1x384xf32, #tpu.memory_space<vmem>>
        %193 = tpu.memref_slice %arg11[%146, %c5_i32_150] : memref<2x8x!tpu.dma_semaphore, #tpu.memory_space<semaphore_mem>> -> memref<1x1x!tpu.dma_semaphore, #tpu.memory_space<semaphore_mem>>
        %194 = tpu.memref_squeeze %193 : memref<1x1x!tpu.dma_semaphore, #tpu.memory_space<semaphore_mem>> -> memref<!tpu.dma_semaphore, #tpu.memory_space<semaphore_mem>>
        tpu.enqueue_dma source(%190 : memref<1x384xf32, #tpu.memory_space<any>>) target(%192 : memref<1x384xf32, #tpu.memory_space<vmem>>) target_semaphore(%194 : memref<!tpu.dma_semaphore, #tpu.memory_space<semaphore_mem>>)
        %c6_i32_154 = arith.constant 6 : i32
        %195 = arith.addi %145, %c6_i32_154 : i32
        %196 = arith.index_cast %195 : i32 to index
        %197 = memref.load %arg1[%196] : memref<64xi32, #tpu.memory_space<smem>>
        %c6_i32_155 = arith.constant 6 : i32
        %c0_i32_156 = arith.constant 0 : i32
        %198 = tpu.memref_slice %arg2[%197, %c0_i32_156] : memref<32x384xf32, #tpu.memory_space<any>> -> memref<1x384xf32, #tpu.memory_space<any>>
        %c6_i32_157 = arith.constant 6 : i32
        %c0_i32_158 = arith.constant 0 : i32
        %199 = tpu.memref_slice %arg10[%146, %c6_i32_157, %c0_i32_158] : memref<2x8x384xf32, #tpu.memory_space<vmem>> -> memref<1x1x384xf32, #tpu.memory_space<vmem>>
        %200 = tpu.memref_squeeze %199 : memref<1x1x384xf32, #tpu.memory_space<vmem>> -> memref<1x384xf32, #tpu.memory_space<vmem>>
        %201 = tpu.memref_slice %arg11[%146, %c6_i32_155] : memref<2x8x!tpu.dma_semaphore, #tpu.memory_space<semaphore_mem>> -> memref<1x1x!tpu.dma_semaphore, #tpu.memory_space<semaphore_mem>>
        %202 = tpu.memref_squeeze %201 : memref<1x1x!tpu.dma_semaphore, #tpu.memory_space<semaphore_mem>> -> memref<!tpu.dma_semaphore, #tpu.memory_space<semaphore_mem>>
        tpu.enqueue_dma source(%198 : memref<1x384xf32, #tpu.memory_space<any>>) target(%200 : memref<1x384xf32, #tpu.memory_space<vmem>>) target_semaphore(%202 : memref<!tpu.dma_semaphore, #tpu.memory_space<semaphore_mem>>)
        %c7_i32_159 = arith.constant 7 : i32
        %203 = arith.addi %145, %c7_i32_159 : i32
        %204 = arith.index_cast %203 : i32 to index
        %205 = memref.load %arg1[%204] : memref<64xi32, #tpu.memory_space<smem>>
        %c7_i32_160 = arith.constant 7 : i32
        %c0_i32_161 = arith.constant 0 : i32
        %206 = tpu.memref_slice %arg2[%205, %c0_i32_161] : memref<32x384xf32, #tpu.memory_space<any>> -> memref<1x384xf32, #tpu.memory_space<any>>
        %c7_i32_162 = arith.constant 7 : i32
        %c0_i32_163 = arith.constant 0 : i32
        %207 = tpu.memref_slice %arg10[%146, %c7_i32_162, %c0_i32_163] : memref<2x8x384xf32, #tpu.memory_space<vmem>> -> memref<1x1x384xf32, #tpu.memory_space<vmem>>
        %208 = tpu.memref_squeeze %207 : memref<1x1x384xf32, #tpu.memory_space<vmem>> -> memref<1x384xf32, #tpu.memory_space<vmem>>
        %209 = tpu.memref_slice %arg11[%146, %c7_i32_160] : memref<2x8x!tpu.dma_semaphore, #tpu.memory_space<semaphore_mem>> -> memref<1x1x!tpu.dma_semaphore, #tpu.memory_space<semaphore_mem>>
        %210 = tpu.memref_squeeze %209 : memref<1x1x!tpu.dma_semaphore, #tpu.memory_space<semaphore_mem>> -> memref<!tpu.dma_semaphore, #tpu.memory_space<semaphore_mem>>
        tpu.enqueue_dma source(%206 : memref<1x384xf32, #tpu.memory_space<any>>) target(%208 : memref<1x384xf32, #tpu.memory_space<vmem>>) target_semaphore(%210 : memref<!tpu.dma_semaphore, #tpu.memory_space<semaphore_mem>>)
      } else {
      }
      %c0_i32_77 = arith.constant 0 : i32
      %c0_i32_78 = arith.constant 0 : i32
      %c0_i32_79 = arith.constant 0 : i32
      %96 = tpu.memref_slice %arg2[%c0_i32_78, %c0_i32_79] : memref<32x384xf32, #tpu.memory_space<any>> -> memref<1x384xf32, #tpu.memory_space<any>>
      %c0_i32_80 = arith.constant 0 : i32
      %c0_i32_81 = arith.constant 0 : i32
      %97 = tpu.memref_slice %arg10[%91, %c0_i32_80, %c0_i32_81] : memref<2x8x384xf32, #tpu.memory_space<vmem>> -> memref<1x1x384xf32, #tpu.memory_space<vmem>>
      %98 = tpu.memref_squeeze %97 : memref<1x1x384xf32, #tpu.memory_space<vmem>> -> memref<1x384xf32, #tpu.memory_space<vmem>>
      %99 = tpu.memref_slice %arg11[%91, %c0_i32_77] : memref<2x8x!tpu.dma_semaphore, #tpu.memory_space<semaphore_mem>> -> memref<1x1x!tpu.dma_semaphore, #tpu.memory_space<semaphore_mem>>
      %100 = tpu.memref_squeeze %99 : memref<1x1x!tpu.dma_semaphore, #tpu.memory_space<semaphore_mem>> -> memref<!tpu.dma_semaphore, #tpu.memory_space<semaphore_mem>>
      tpu.wait_dma2 semaphore(%100 : memref<!tpu.dma_semaphore, #tpu.memory_space<semaphore_mem>>) src(%96 : memref<1x384xf32, #tpu.memory_space<any>>) dst(%98 : memref<1x384xf32, #tpu.memory_space<vmem>>)
      %c1_i32_82 = arith.constant 1 : i32
      %c0_i32_83 = arith.constant 0 : i32
      %c0_i32_84 = arith.constant 0 : i32
      %101 = tpu.memref_slice %arg2[%c0_i32_83, %c0_i32_84] : memref<32x384xf32, #tpu.memory_space<any>> -> memref<1x384xf32, #tpu.memory_space<any>>
      %c1_i32_85 = arith.constant 1 : i32
      %c0_i32_86 = arith.constant 0 : i32
      %102 = tpu.memref_slice %arg10[%91, %c1_i32_85, %c0_i32_86] : memref<2x8x384xf32, #tpu.memory_space<vmem>> -> memref<1x1x384xf32, #tpu.memory_space<vmem>>
      %103 = tpu.memref_squeeze %102 : memref<1x1x384xf32, #tpu.memory_space<vmem>> -> memref<1x384xf32, #tpu.memory_space<vmem>>
      %104 = tpu.memref_slice %arg11[%91, %c1_i32_82] : memref<2x8x!tpu.dma_semaphore, #tpu.memory_space<semaphore_mem>> -> memref<1x1x!tpu.dma_semaphore, #tpu.memory_space<semaphore_mem>>
      %105 = tpu.memref_squeeze %104 : memref<1x1x!tpu.dma_semaphore, #tpu.memory_space<semaphore_mem>> -> memref<!tpu.dma_semaphore, #tpu.memory_space<semaphore_mem>>
      tpu.wait_dma2 semaphore(%105 : memref<!tpu.dma_semaphore, #tpu.memory_space<semaphore_mem>>) src(%101 : memref<1x384xf32, #tpu.memory_space<any>>) dst(%103 : memref<1x384xf32, #tpu.memory_space<vmem>>)
      %c2_i32_87 = arith.constant 2 : i32
      %c0_i32_88 = arith.constant 0 : i32
      %c0_i32_89 = arith.constant 0 : i32
      %106 = tpu.memref_slice %arg2[%c0_i32_88, %c0_i32_89] : memref<32x384xf32, #tpu.memory_space<any>> -> memref<1x384xf32, #tpu.memory_space<any>>
      %c2_i32_90 = arith.constant 2 : i32
      %c0_i32_91 = arith.constant 0 : i32
      %107 = tpu.memref_slice %arg10[%91, %c2_i32_90, %c0_i32_91] : memref<2x8x384xf32, #tpu.memory_space<vmem>> -> memref<1x1x384xf32, #tpu.memory_space<vmem>>
      %108 = tpu.memref_squeeze %107 : memref<1x1x384xf32, #tpu.memory_space<vmem>> -> memref<1x384xf32, #tpu.memory_space<vmem>>
      %109 = tpu.memref_slice %arg11[%91, %c2_i32_87] : memref<2x8x!tpu.dma_semaphore, #tpu.memory_space<semaphore_mem>> -> memref<1x1x!tpu.dma_semaphore, #tpu.memory_space<semaphore_mem>>
      %110 = tpu.memref_squeeze %109 : memref<1x1x!tpu.dma_semaphore, #tpu.memory_space<semaphore_mem>> -> memref<!tpu.dma_semaphore, #tpu.memory_space<semaphore_mem>>
      tpu.wait_dma2 semaphore(%110 : memref<!tpu.dma_semaphore, #tpu.memory_space<semaphore_mem>>) src(%106 : memref<1x384xf32, #tpu.memory_space<any>>) dst(%108 : memref<1x384xf32, #tpu.memory_space<vmem>>)
      %c3_i32_92 = arith.constant 3 : i32
      %c0_i32_93 = arith.constant 0 : i32
      %c0_i32_94 = arith.constant 0 : i32
      %111 = tpu.memref_slice %arg2[%c0_i32_93, %c0_i32_94] : memref<32x384xf32, #tpu.memory_space<any>> -> memref<1x384xf32, #tpu.memory_space<any>>
      %c3_i32_95 = arith.constant 3 : i32
      %c0_i32_96 = arith.constant 0 : i32
      %112 = tpu.memref_slice %arg10[%91, %c3_i32_95, %c0_i32_96] : memref<2x8x384xf32, #tpu.memory_space<vmem>> -> memref<1x1x384xf32, #tpu.memory_space<vmem>>
      %113 = tpu.memref_squeeze %112 : memref<1x1x384xf32, #tpu.memory_space<vmem>> -> memref<1x384xf32, #tpu.memory_space<vmem>>
      %114 = tpu.memref_slice %arg11[%91, %c3_i32_92] : memref<2x8x!tpu.dma_semaphore, #tpu.memory_space<semaphore_mem>> -> memref<1x1x!tpu.dma_semaphore, #tpu.memory_space<semaphore_mem>>
      %115 = tpu.memref_squeeze %114 : memref<1x1x!tpu.dma_semaphore, #tpu.memory_space<semaphore_mem>> -> memref<!tpu.dma_semaphore, #tpu.memory_space<semaphore_mem>>
      tpu.wait_dma2 semaphore(%115 : memref<!tpu.dma_semaphore, #tpu.memory_space<semaphore_mem>>) src(%111 : memref<1x384xf32, #tpu.memory_space<any>>) dst(%113 : memref<1x384xf32, #tpu.memory_space<vmem>>)
      %c4_i32_97 = arith.constant 4 : i32
      %c0_i32_98 = arith.constant 0 : i32
      %c0_i32_99 = arith.constant 0 : i32
      %116 = tpu.memref_slice %arg2[%c0_i32_98, %c0_i32_99] : memref<32x384xf32, #tpu.memory_space<any>> -> memref<1x384xf32, #tpu.memory_space<any>>
      %c4_i32_100 = arith.constant 4 : i32
      %c0_i32_101 = arith.constant 0 : i32
      %117 = tpu.memref_slice %arg10[%91, %c4_i32_100, %c0_i32_101] : memref<2x8x384xf32, #tpu.memory_space<vmem>> -> memref<1x1x384xf32, #tpu.memory_space<vmem>>
      %118 = tpu.memref_squeeze %117 : memref<1x1x384xf32, #tpu.memory_space<vmem>> -> memref<1x384xf32, #tpu.memory_space<vmem>>
      %119 = tpu.memref_slice %arg11[%91, %c4_i32_97] : memref<2x8x!tpu.dma_semaphore, #tpu.memory_space<semaphore_mem>> -> memref<1x1x!tpu.dma_semaphore, #tpu.memory_space<semaphore_mem>>
      %120 = tpu.memref_squeeze %119 : memref<1x1x!tpu.dma_semaphore, #tpu.memory_space<semaphore_mem>> -> memref<!tpu.dma_semaphore, #tpu.memory_space<semaphore_mem>>
      tpu.wait_dma2 semaphore(%120 : memref<!tpu.dma_semaphore, #tpu.memory_space<semaphore_mem>>) src(%116 : memref<1x384xf32, #tpu.memory_space<any>>) dst(%118 : memref<1x384xf32, #tpu.memory_space<vmem>>)
      %c5_i32_102 = arith.constant 5 : i32
      %c0_i32_103 = arith.constant 0 : i32
      %c0_i32_104 = arith.constant 0 : i32
      %121 = tpu.memref_slice %arg2[%c0_i32_103, %c0_i32_104] : memref<32x384xf32, #tpu.memory_space<any>> -> memref<1x384xf32, #tpu.memory_space<any>>
      %c5_i32_105 = arith.constant 5 : i32
      %c0_i32_106 = arith.constant 0 : i32
      %122 = tpu.memref_slice %arg10[%91, %c5_i32_105, %c0_i32_106] : memref<2x8x384xf32, #tpu.memory_space<vmem>> -> memref<1x1x384xf32, #tpu.memory_space<vmem>>
      %123 = tpu.memref_squeeze %122 : memref<1x1x384xf32, #tpu.memory_space<vmem>> -> memref<1x384xf32, #tpu.memory_space<vmem>>
      %124 = tpu.memref_slice %arg11[%91, %c5_i32_102] : memref<2x8x!tpu.dma_semaphore, #tpu.memory_space<semaphore_mem>> -> memref<1x1x!tpu.dma_semaphore, #tpu.memory_space<semaphore_mem>>
      %125 = tpu.memref_squeeze %124 : memref<1x1x!tpu.dma_semaphore, #tpu.memory_space<semaphore_mem>> -> memref<!tpu.dma_semaphore, #tpu.memory_space<semaphore_mem>>
      tpu.wait_dma2 semaphore(%125 : memref<!tpu.dma_semaphore, #tpu.memory_space<semaphore_mem>>) src(%121 : memref<1x384xf32, #tpu.memory_space<any>>) dst(%123 : memref<1x384xf32, #tpu.memory_space<vmem>>)
      %c6_i32_107 = arith.constant 6 : i32
      %c0_i32_108 = arith.constant 0 : i32
      %c0_i32_109 = arith.constant 0 : i32
      %126 = tpu.memref_slice %arg2[%c0_i32_108, %c0_i32_109] : memref<32x384xf32, #tpu.memory_space<any>> -> memref<1x384xf32, #tpu.memory_space<any>>
      %c6_i32_110 = arith.constant 6 : i32
      %c0_i32_111 = arith.constant 0 : i32
      %127 = tpu.memref_slice %arg10[%91, %c6_i32_110, %c0_i32_111] : memref<2x8x384xf32, #tpu.memory_space<vmem>> -> memref<1x1x384xf32, #tpu.memory_space<vmem>>
      %128 = tpu.memref_squeeze %127 : memref<1x1x384xf32, #tpu.memory_space<vmem>> -> memref<1x384xf32, #tpu.memory_space<vmem>>
      %129 = tpu.memref_slice %arg11[%91, %c6_i32_107] : memref<2x8x!tpu.dma_semaphore, #tpu.memory_space<semaphore_mem>> -> memref<1x1x!tpu.dma_semaphore, #tpu.memory_space<semaphore_mem>>
      %130 = tpu.memref_squeeze %129 : memref<1x1x!tpu.dma_semaphore, #tpu.memory_space<semaphore_mem>> -> memref<!tpu.dma_semaphore, #tpu.memory_space<semaphore_mem>>
      tpu.wait_dma2 semaphore(%130 : memref<!tpu.dma_semaphore, #tpu.memory_space<semaphore_mem>>) src(%126 : memref<1x384xf32, #tpu.memory_space<any>>) dst(%128 : memref<1x384xf32, #tpu.memory_space<vmem>>)
      %c7_i32_112 = arith.constant 7 : i32
      %c0_i32_113 = arith.constant 0 : i32
      %c0_i32_114 = arith.constant 0 : i32
      %131 = tpu.memref_slice %arg2[%c0_i32_113, %c0_i32_114] : memref<32x384xf32, #tpu.memory_space<any>> -> memref<1x384xf32, #tpu.memory_space<any>>
      %c7_i32_115 = arith.constant 7 : i32
      %c0_i32_116 = arith.constant 0 : i32
      %132 = tpu.memref_slice %arg10[%91, %c7_i32_115, %c0_i32_116] : memref<2x8x384xf32, #tpu.memory_space<vmem>> -> memref<1x1x384xf32, #tpu.memory_space<vmem>>
      %133 = tpu.memref_squeeze %132 : memref<1x1x384xf32, #tpu.memory_space<vmem>> -> memref<1x384xf32, #tpu.memory_space<vmem>>
      %134 = tpu.memref_slice %arg11[%91, %c7_i32_112] : memref<2x8x!tpu.dma_semaphore, #tpu.memory_space<semaphore_mem>> -> memref<1x1x!tpu.dma_semaphore, #tpu.memory_space<semaphore_mem>>
      %135 = tpu.memref_squeeze %134 : memref<1x1x!tpu.dma_semaphore, #tpu.memory_space<semaphore_mem>> -> memref<!tpu.dma_semaphore, #tpu.memory_space<semaphore_mem>>
      tpu.wait_dma2 semaphore(%135 : memref<!tpu.dma_semaphore, #tpu.memory_space<semaphore_mem>>) src(%131 : memref<1x384xf32, #tpu.memory_space<any>>) dst(%133 : memref<1x384xf32, #tpu.memory_space<vmem>>)
      %136 = arith.index_cast %91 : i32 to index
      %c0_117 = arith.constant 0 : index
      %c0_118 = arith.constant 0 : index
      %137 = vector.load %arg10[%136, %c0_117, %c0_118] : memref<2x8x384xf32, #tpu.memory_space<vmem>>, vector<1x8x384xf32>
      %138 = vector.shape_cast %137 : vector<1x8x384xf32> to vector<8x384xf32>
      %cst_119 = arith.constant dense<0.000000e+00> : vector<384xf32>
      %139 = vector.multi_reduction <add>, %138, %cst_119 [0] : vector<8x384xf32> to vector<384xf32>
      %140 = vector.shape_cast %139 : vector<384xf32> to vector<1x384xf32>
      %141 = arith.index_cast %90 : i32 to index
      %c0_120 = arith.constant 0 : index
      %142 = vector.load %arg12[%141, %c0_120] : memref<8x384xf32, #tpu.memory_space<vmem>>, vector<1x384xf32>
      tpu.vector_store %arg12[%141, %c0_120], %140 {strides = array<i32>} : memref<8x384xf32, #tpu.memory_space<vmem>>, vector<1x384xf32>,
    }
    %c8_i32_50 = arith.constant 8 : i32
    %c0 = arith.constant 0 : index
    %c0_51 = arith.constant 0 : index
    %66 = vector.load %arg12[%c0, %c0_51] : memref<8x384xf32, #tpu.memory_space<vmem>>, vector<8x384xf32>
    %cst = arith.constant 1.250000e-01 : f32
    %67 = vector.broadcast %cst : f32 to vector<8x384xf32>
    %68 = arith.mulf %66, %67 : vector<8x384xf32>
    %c0_52 = arith.constant 0 : index
    %c0_53 = arith.constant 0 : index
    %69 = vector.load %arg3[%c0_52, %c0_53] : memref<384x256xf32, #tpu.memory_space<vmem>>, vector<384x256xf32>
    %cst_54 = arith.constant dense<0.000000e+00> : vector<8x256xf32>
    %70 = tpu.matmul %68, %69, %cst_54 {dimension_numbers = #tpu.dot_dimension_numbers<[1], [0], [0], [1], [0, 0, 1, 1], [], []>} : vector<8x384xf32>, vector<384x256xf32>, vector<8x256xf32> -> vector<8x256xf32>
    %c0_55 = arith.constant 0 : index
    %c0_56 = arith.constant 0 : index
    %71 = vector.load %arg4[%c0_55, %c0_56] : memref<1x256xf32, #tpu.memory_space<vmem>>, vector<1x256xf32>
    %72 = vector.broadcast %71 : vector<1x256xf32> to vector<8x256xf32>
    %73 = arith.addf %70, %72 : vector<8x256xf32>
    %cst_57 = arith.constant 0.000000e+00 : f32
    %74 = vector.broadcast %cst_57 : f32 to vector<8x256xf32>
    %75 = arith.maximumf %73, %74 : vector<8x256xf32>
    %c0_58 = arith.constant 0 : index
    %c0_59 = arith.constant 0 : index
    %76 = vector.load %arg5[%c0_58, %c0_59] : memref<256x256xf32, #tpu.memory_space<vmem>>, vector<256x256xf32>
    %cst_60 = arith.constant dense<0.000000e+00> : vector<8x256xf32>
    %77 = tpu.matmul %75, %76, %cst_60 {dimension_numbers = #tpu.dot_dimension_numbers<[1], [0], [0], [1], [0, 0, 1, 1], [], []>} : vector<8x256xf32>, vector<256x256xf32>, vector<8x256xf32> -> vector<8x256xf32>
    %c0_61 = arith.constant 0 : index
    %c0_62 = arith.constant 0 : index
    %78 = vector.load %arg6[%c0_61, %c0_62] : memref<1x256xf32, #tpu.memory_space<vmem>>, vector<1x256xf32>
    %79 = vector.broadcast %78 : vector<1x256xf32> to vector<8x256xf32>
    %80 = arith.addf %77, %79 : vector<8x256xf32>
    %cst_63 = arith.constant 0.000000e+00 : f32
    %81 = vector.broadcast %cst_63 : f32 to vector<8x256xf32>
    %82 = arith.maximumf %80, %81 : vector<8x256xf32>
    %c0_64 = arith.constant 0 : index
    %c0_65 = arith.constant 0 : index
    %83 = vector.load %arg7[%c0_64, %c0_65] : memref<256x128xf32, #tpu.memory_space<vmem>>, vector<256x128xf32>
    %cst_66 = arith.constant dense<0.000000e+00> : vector<8x128xf32>
    %84 = tpu.matmul %82, %83, %cst_66 {dimension_numbers = #tpu.dot_dimension_numbers<[1], [0], [0], [1], [0, 0, 1, 1], [], []>} : vector<8x256xf32>, vector<256x128xf32>, vector<8x128xf32> -> vector<8x128xf32>
    %c0_67 = arith.constant 0 : index
    %c0_68 = arith.constant 0 : index
    %85 = vector.load %arg8[%c0_67, %c0_68] : memref<1x128xf32, #tpu.memory_space<vmem>>, vector<1x128xf32>
    %86 = vector.broadcast %85 : vector<1x128xf32> to vector<8x128xf32>
    %87 = arith.addf %84, %86 : vector<8x128xf32>
    %c0_69 = arith.constant 0 : index
    %c0_70 = arith.constant 0 : index
    %88 = vector.load %arg9[%c0_69, %c0_70] : memref<8x128xf32, #tpu.memory_space<vmem>>, vector<8x128xf32>
    tpu.vector_store %arg9[%c0_69, %c0_70], %87 {strides = array<i32>} : memref<8x128xf32, #tpu.memory_space<vmem>>, vector<8x128xf32>,
    return
  }
  func.func @transform_1(%arg0: i32, %arg1: memref<64xi32, #tpu.memory_space<smem>>) -> (i32, i32) {
    %c0_i32 = arith.constant 0 : i32
    %c0_i32_0 = arith.constant 0 : i32
    %c0_i32_1 = arith.constant 0 : i32
    return %c0_i32, %c0_i32_0 : i32, i32
  }
  func.func @transform_2(%arg0: i32, %arg1: memref<64xi32, #tpu.memory_space<smem>>) -> (i32, i32) {
    %c0_i32 = arith.constant 0 : i32
    %c0_i32_0 = arith.constant 0 : i32
    %c0_i32_1 = arith.constant 0 : i32
    return %c0_i32, %c0_i32_0 : i32, i32
  }
  func.func @transform_3(%arg0: i32, %arg1: memref<64xi32, #tpu.memory_space<smem>>) -> (i32, i32) {
    %c0_i32 = arith.constant 0 : i32
    %c0_i32_0 = arith.constant 0 : i32
    %c0_i32_1 = arith.constant 0 : i32
    return %c0_i32, %c0_i32_0 : i32, i32
  }
  func.func @transform_4(%arg0: i32, %arg1: memref<64xi32, #tpu.memory_space<smem>>) -> (i32, i32) {
    %c0_i32 = arith.constant 0 : i32
    %c0_i32_0 = arith.constant 0 : i32
    %c0_i32_1 = arith.constant 0 : i32
    return %c0_i32, %c0_i32_0 : i32, i32
  }
  func.func @transform_5(%arg0: i32, %arg1: memref<64xi32, #tpu.memory_space<smem>>) -> (i32, i32) {
    %c0_i32 = arith.constant 0 : i32
    %c0_i32_0 = arith.constant 0 : i32
    %c0_i32_1 = arith.constant 0 : i32
    return %c0_i32, %c0_i32_0 : i32, i32
  }
  func.func @transform_6(%arg0: i32, %arg1: memref<64xi32, #tpu.memory_space<smem>>) -> (i32, i32) {
    %c0_i32 = arith.constant 0 : i32
    %c0_i32_0 = arith.constant 0 : i32
    %c0_i32_1 = arith.constant 0 : i32
    return %c0_i32, %c0_i32_0 : i32, i32
  }
  func.func @transform_7(%arg0: i32, %arg1: memref<64xi32, #tpu.memory_space<smem>>) -> (i32, i32) {
    %c0_i32 = arith.constant 0 : i32
    %c0_i32_0 = arith.constant 0 : i32
    return %arg0, %c0_i32 : i32, i32
  }
}

</mosaic_0001>

<bundles_post_ra>
// kernel: tpu_custom_call.1
= control target key start
LH: loop header
LB: loop body
LE: loop exit
PB: predicated region body
PF: predicated region fallthrough
CT: control target
= control target key end

     0   :  { %s2748_s0 = inlined_call_operand.hbm [shape: s32[64], index: 0, kind: input, shape index: {}]   ;;  %s2749_s1 = inlined_call_operand.hbm [shape: f32[32,384], index: 1, kind: input, shape index: {}]   ;;  %s2750_s2 = inlined_call_operand.hbm [shape: f32[384,256], index: 2, kind: input, shape index: {}]   ;;  %s2751_s3 = inlined_call_operand.vmem [shape: f32[1,256], index: 3, kind: input, shape index: {}]   ;;  %s2752_s4 = inlined_call_operand.hbm [shape: f32[256,256], index: 4, kind: input, shape index: {}]   ;;  %s2753_s5 = inlined_call_operand.vmem [shape: f32[1,256], index: 5, kind: input, shape index: {}]   ;;  %s2754_s6 = inlined_call_operand.hbm [shape: f32[256,128], index: 6, kind: input, shape index: {}]   ;;  %s2755_s7 = inlined_call_operand.vmem [shape: f32[1,128], index: 7, kind: input, shape index: {}]   ;;  %s2756_s8 = inlined_call_operand.hbm [shape: f32[8,128], index: 8, kind: output, shape index: {}]  }
   0x1   :  { %2760 = sst [smem:[#allocation50_spill]] %s2751_s3  ;;  %s1574_s29 = scalar_lea.hbm %s2748_s0, 16 }
   0x2   :  { %2761 = sst [smem:[#allocation51_spill]] %s2753_s5  ;;  %p1575_p0 = scmp.ne.s32.totalorder %s2748_s0, %s1574_s29 }
   0x3   :  { %2762 = sst [smem:[#allocation52_spill]] %s2755_s7  ;;  %p1578_p1 = scmp.lt.u32.totalorder %s1574_s29, %s2748_s0 }
   0x4   :  { %2763 = sst [smem:[#allocation53_spill]] %s2756_s8 }
   0x5   :  { %p1580_p2 = pnand %p1578_p1, %p1575_p0 }
   0x7   :  { %1583 = shalt.err (!%p1580_p2)  }
   0x8   :  { %s2120_s12 = smov [#allocation6]  }
   0x9   :  { %14 = dma.hbm_to_smem %s2748_s0, 16, %s2120_s12, [#allocation5] }
   0xa   :  { %2092 = dma.done.wait [#allocation5], 16 }
   0xb   :  { %2093 = vsyncadd [#allocation5], 4294967280 }
   0xc   :  { %16 = sfence }
   0xd   :  { %17 = vsyncpa [#allocation8], 0 }
   0xe   :  { %18 = vsyncpa [#allocation11], 0 }
   0xf   :  { %19 = vsyncpa [#allocation9], 0  ;;  %s2121_s15 = smov [#allocation10]   ;;  %s2122_s17 = smov [#allocation7]  }
  0x10   :  { %s39_s16 = sshll.u32 %s2121_s15, 4  ;;  %s25_s18 = sshll.u32 %s2122_s17, 4  ;;  %s40_s16 = int_to_ptr.vmem [resolvable:$true] %s39_s16  ;;  %s2199_s18 = int_to_ptr.vmem [resolvable:$true] %s25_s18 }
  0x11   :  { %s1584_s21 = scalar_lea.hbm %s2752_s4, 8192 }
  0x12   :  { %p1585_p3 = scmp.ne.s32.totalorder %s2752_s4, %s1584_s21  ;;  %p1588_p4 = scmp.lt.u32.totalorder %s1584_s21, %s2752_s4 }
  0x14   :  { %p1590_p5 = pnand %p1588_p4, %p1585_p3 }
  0x16   :  { %1593 = shalt.err (!%p1590_p5)
}
  0x17   :  { %s1594_s25 = scalar_lea.vmem %s40_s16, 8192  ;;  %p1599_p7 = scmp.lt.s32.totalorder %s40_s16, %s40_s16 }
  0x18   :  { %p1595_p6 = scmp.ne.s32.totalorder %s40_s16, %s1594_s25  ;;  %p1600_p8 = scmp.lt.s32.totalorder %s1594_s25, %s1594_s25 }
  0x1a   :  { %p1601_p9 = por %p1600_p8, %p1599_p7 }
  0x1c   :  { %p1602_p10 = pnand %p1601_p9, %p1595_p6 }
  0x1e   :  { %1605 = shalt.err (!%p1602_p10)
}
  0x1f   :  { %s2123_s26 = smov 256   ;;  %s2124_s27 = smov 16  }
  0x20   :  { %45 = dma.hbm_to_vmem [thread:$0]  %s2752_s4, 8192, %s40_s16, [#allocation11], %s2123_s26, %s2123_s26, %s2124_s27  }
  0x21   :  { %s1606_s10 = scalar_lea.hbm %s2750_s2, 12288 }
  0x22   :  { %p1607_p11 = scmp.ne.s32.totalorder %s2750_s2, %s1606_s10  ;;  %p1610_p12 = scmp.lt.u32.totalorder %s1606_s10, %s2750_s2 }
  0x24   :  { %p1612_p13 = pnand %p1610_p12, %p1607_p11 }
  0x26   :  { %1615 = shalt.err (!%p1612_p13)
}
  0x27   :  { %s1616_s15 = scalar_lea.vmem %s2199_s18, 12288  ;;  %p1621_p1 = scmp.lt.s32.totalorder %s2199_s18, %s2199_s18 }
  0x28   :  { %p1617_p0 = scmp.ne.s32.totalorder %s2199_s18, %s1616_s15  ;;  %p1622_p2 = scmp.lt.s32.totalorder %s1616_s15, %s1616_s15 }
  0x2a   :  { %p1623_p3 = por %p1622_p2, %p1621_p1 }
  0x2c   :  { %p1624_p4 = pnand %p1623_p3, %p1617_p0 }
  0x2e   :  { %1627 = shalt.err (!%p1624_p4)
}
  0x2f   :  { %31 = dma.hbm_to_vmem [thread:$0]  %s2750_s2, 12288, %s2199_s18, [#allocation8], %s2123_s26, %s2123_s26, %s2124_s27  }
  0x30   :  { %s2125_s17 = smov [#allocation12]   ;;  %s1628_s22 = scalar_lea.hbm %s2754_s6, 4096 }
  0x31   :  { %s53_s19 = sshll.u32 %s2125_s17, 4  ;;  %p1629_p5 = scmp.ne.s32.totalorder %s2754_s6, %s1628_s22  ;;  %s54_s19 = int_to_ptr.vmem [resolvable:$true] %s53_s19 }
  0x32   :  { %p1632_p6 = scmp.lt.u32.totalorder %s1628_s22, %s2754_s6 }
  0x34   :  { %p1634_p7 = pnand %p1632_p6, %p1629_p5 }
  0x36   :  { %1637 = shalt.err (!%p1634_p7)
}
  0x37   :  { %s1638_s28 = scalar_lea.vmem %s54_s19, 4096  ;;  %p1643_p9 = scmp.lt.s32.totalorder %s54_s19, %s54_s19 }
  0x38   :  { %p1639_p8 = scmp.ne.s32.totalorder %s54_s19, %s1638_s28  ;;  %p1644_p10 = scmp.lt.s32.totalorder %s1638_s28, %s1638_s28 }
  0x3a   :  { %p1645_p11 = por %p1644_p10, %p1643_p9 }
  0x3c   :  { %p1646_p12 = pnand %p1645_p11, %p1639_p8 }
  0x3e   :  { %1649 = shalt.err (!%p1646_p12)
}
  0x3f   :  { %s2757_s2 = smov 128   ;;  %s2127_s18 = smov 8  }
  0x40   :  { %59 = dma.hbm_to_vmem [thread:$0]  %s2754_s6, 4096, %s54_s19, [#allocation11], %s2757_s2, %s2757_s2, %s2127_s18  }
  0x41   :  { %2094 = dma.done.wait [#allocation8], 12288  }
  0x42   :  { %2095 = vsyncadd [#allocation8], 4294955008 }
  0x43   :  { %2096 = dma.done.wait [#allocation11], 12288  }
  0x44   :  { %2097 = vsyncadd [#allocation11], 4294955008  ;;  %s72_s29 = sld [smem:[#allocation6]]  ;;  %s2128_s30 = smov [#allocation2]  }
  0x45   :  { %s80_s9 = sshll.u32 %s2128_s30, 4  ;;  %s1225_s10 = sld [smem:[#allocation6 + $0x1]]  ;;  %s2244_s9 = int_to_ptr.vmem [resolvable:$true] %s80_s9 }
  0x46   :  { %s2246_s11 = sld [smem:[#allocation6 + $0x2]]  ;;  %s2129_s12 = smov [#allocation2 + $0x1]  }
  0x47   :  { %s95_s13 = sshll.u32 %s2129_s12, 4  ;;  %s2130_s14 = smov [#allocation2 + $0x2]   ;;  %s2248_s13 = int_to_ptr.vmem [resolvable:$true] %s95_s13 }
  0x48   :  { %s110_s15 = sshll.u32 %s2130_s14, 4  ;;  %s2252_s6 = sld [smem:[#allocation6 + $0x3]]  ;;  %s2250_s15 = int_to_ptr.vmem [resolvable:$true] %s110_s15 }
  0x49   :  { %s2261_s14 = scalar_lea.hbm %s2749_s1, 1536 }
  0x4a   :  { %s73_s4 = sshrl.u32 %s72_s29, 3  ;;  %s74_s16 = sand.u32 7, %s72_s29  }
  0x4b   :  { %s75_s17 = smul.u32 24, %s73_s4  ;;  %s86_s19 = sshrl.u32 %s1225_s10, 3 }
  0x4c   :  { %s87_s20 = sand.u32 7, %s1225_s10   ;;  %s88_s21 = smul.u32 24, %s86_s19 }
  0x4d   :  { %s76_s22 = sadd.s32 %s75_s17, %s74_s16  ;;  %s101_s23 = sshrl.u32 %s2246_s11, 3 }
  0x4e   :  { %s1224_s0 = sshll.u32 %s76_s22, 4  ;;  %s89_s24 = sadd.s32 %s88_s21, %s87_s20 }
  0x4f   :  { %s78_s18 = scalar_lea.hbm %s2749_s1, %s1224_s0  ;;  %s1226_s26 = sshll.u32 %s89_s24, 4 }
  0x50   :  { %s1650_s27 = scalar_lea.hbm %s78_s18, 48  ;;  %p1653_p0 = scmp.lt.u32.totalorder %s78_s18, %s2749_s1 }
  0x51   :  { %p1651_p13 = scmp.ne.s32.totalorder %s78_s18, %s1650_s27  ;;  %p1654_p1 = scmp.lt.u32.totalorder %s2261_s14, %s1650_s27 }
  0x52   :  { %p1656_p3 = scmp.lt.u32.totalorder %s1650_s27, %s78_s18 }
  0x53   :  { %p1655_p2 = por %p1654_p1, %p1653_p0 }
  0x55   :  { %p1657_p4 = por %p1656_p3, %p1655_p2 }
  0x57   :  { %p1658_p5 = pnand %p1657_p4, %p1651_p13 }
  0x59   :  { %1661 = shalt.err (!%p1658_p5)  }
  0x5a   :  { %s1662_s10 = scalar_lea.vmem %s2244_s9, 48  ;;  %s2270_s16 = scalar_lea.vmem %s2244_s9, 768 }
  0x5b   :  { %p1663_p6 = scmp.ne.s32.totalorder %s2244_s9, %s1662_s10  ;;  %p1667_p7 = scmp.lt.s32.totalorder %s2244_s9, %s2244_s9 }
  0x5c   :  { %p1668_p8 = scmp.lt.s32.totalorder %s2270_s16, %s1662_s10 }
  0x5e   :  { %p1669_p9 = por %p1668_p8, %p1667_p7 }
  0x60   :  { %p1670_p10 = pnand %p1669_p9, %p1663_p6 }
  0x62   :  { %1673 = shalt.err (!%p1670_p10)  }
  0x63   :  { %s2131_s17 = smov 1   ;;  %s91_s21 = scalar_lea.hbm %s2749_s1, %s1226_s26 }
  0x64   :  { %83 = dma.hbm_to_vmem [thread:$0]  %s78_s18, 48, %s2244_s9, [#allocation3], %s2757_s2, %s2757_s2, %s2131_s17 }
  0x65   :  { %s102_s22 = sand.u32 7, %s2246_s11   ;;  %s1674_s0 = scalar_lea.hbm %s91_s21, 48 }
  0x66   :  { %p1675_p11 = scmp.ne.s32.totalorder %s91_s21, %s1674_s0  ;;  %p1677_p12 = scmp.lt.u32.totalorder %s91_s21, %s2749_s1 }
  0x67   :  { %p1678_p13 = scmp.lt.u32.totalorder %s2261_s14, %s1674_s0  ;;  %p1680_p1 = scmp.lt.u32.totalorder %s1674_s0, %s91_s21 }
  0x69   :  { %p1679_p0 = por %p1678_p13, %p1677_p12 }
  0x6b   :  { %p1681_p2 = por %p1680_p1, %p1679_p0 }
  0x6d   :  { %p1682_p3 = pnand %p1681_p2, %p1675_p11 }
  0x6f   :  { %1685 = shalt.err (!%p1682_p3)  }
  0x70   :  { %s1686_s28 = scalar_lea.vmem %s2248_s13, 48  ;;  %p1691_p5 = scmp.lt.s32.totalorder %s2248_s13, %s2244_s9 }
  0x71   :  { %p1687_p4 = scmp.ne.s32.totalorder %s2248_s13, %s1686_s28  ;;  %p1692_p6 = scmp.lt.s32.totalorder %s2270_s16, %s1686_s28 }
  0x73   :  { %p1693_p7 = por %p1692_p6, %p1691_p5 }
  0x75   :  { %p1694_p8 = pnand %p1693_p7, %p1687_p4 }
  0x77   :  { %1697 = shalt.err (!%p1694_p8)  }
  0x78   :  { %98 = dma.hbm_to_vmem [thread:$0]  %s91_s21, 48, %s2248_s13, [#allocation3 + $0x1], %s2757_s2, %s2757_s2, %s2131_s17 }
  0x79   :  { %s103_s18 = smul.u32 24, %s101_s23  ;;  %s116_s26 = sshrl.u32 %s2252_s6, 3 }
  0x7a   :  { %s117_s27 = sand.u32 7, %s2252_s6   ;;  %s118_s30 = smul.u32 24, %s116_s26 }
  0x7b   :  { %s104_s12 = sadd.s32 %s103_s18, %s102_s22 }
  0x7c   :  { %s1228_s29 = sshll.u32 %s104_s12, 4  ;;  %s119_s4 = sadd.s32 %s118_s30, %s117_s27 }
  0x7d   :  { %s106_s20 = scalar_lea.hbm %s2749_s1, %s1228_s29  ;;  %s1230_s0 = sshll.u32 %s119_s4, 4 }
  0x7e   :  { %s1698_s24 = scalar_lea.hbm %s106_s20, 48  ;;  %p1701_p10 = scmp.lt.u32.totalorder %s106_s20, %s2749_s1 }
  0x7f   :  { %p1699_p9 = scmp.ne.s32.totalorder %s106_s20, %s1698_s24  ;;  %p1702_p11 = scmp.lt.u32.totalorder %s2261_s14, %s1698_s24 }
  0x80   :  { %p1704_p13 = scmp.lt.u32.totalorder %s1698_s24, %s106_s20 }
  0x81   :  { %p1703_p12 = por %p1702_p11, %p1701_p10 }
  0x83   :  { %p1705_p0 = por %p1704_p13, %p1703_p12 }
  0x85   :  { %p1706_p1 = pnand %p1705_p0, %p1699_p9 }
  0x87   :  { %1709 = shalt.err (!%p1706_p1)  }
  0x88   :  { %s1710_s11 = scalar_lea.vmem %s2250_s15, 48  ;;  %p1715_p3 = scmp.lt.s32.totalorder %s2250_s15, %s2244_s9 }
  0x89   :  { %p1711_p2 = scmp.ne.s32.totalorder %s2250_s15, %s1710_s11  ;;  %p1716_p4 = scmp.lt.s32.totalorder %s2270_s16, %s1710_s11 }
  0x8b   :  { %p1717_p5 = por %p1716_p4, %p1715_p3 }
  0x8d   :  { %p1718_p6 = pnand %p1717_p5, %p1711_p2 }
  0x8f   :  { %1721 = shalt.err (!%p1718_p6)  }
  0x90   :  { %113 = dma.hbm_to_vmem [thread:$0]  %s106_s20, 48, %s2250_s15, [#allocation3 + $0x2], %s2757_s2, %s2757_s2, %s2131_s17 }
  0x91   :  { %s121_s23 = scalar_lea.hbm %s2749_s1, %s1230_s0  ;;  %s2132_s21 = smov [#allocation2 + $0x3]  }
  0x92   :  { %s125_s22 = sshll.u32 %s2132_s21, 4  ;;  %s2319_s18 = sld [smem:[#allocation6 + $0x4]]  ;;  %s126_s22 = int_to_ptr.vmem [resolvable:$true] %s125_s22 }
  0x93   :  { %s1722_s26 = scalar_lea.hbm %s121_s23, 48  ;;  %p1725_p8 = scmp.lt.u32.totalorder %s121_s23, %s2749_s1 }
  0x94   :  { %p1723_p7 = scmp.ne.s32.totalorder %s121_s23, %s1722_s26  ;;  %p1726_p9 = scmp.lt.u32.totalorder %s2261_s14, %s1722_s26 }
  0x95   :  { %p1728_p11 = scmp.lt.u32.totalorder %s1722_s26, %s121_s23 }
  0x96   :  { %p1727_p10 = por %p1726_p9, %p1725_p8 }
  0x98   :  { %p1729_p12 = por %p1728_p11, %p1727_p10 }
  0x9a   :  { %p1730_p13 = pnand %p1729_p12, %p1723_p7 }
  0x9c   :  { %1733 = shalt.err (!%p1730_p13)  }
  0x9d   :  { %s1734_s15 = scalar_lea.vmem %s126_s22, 48  ;;  %p1739_p1 = scmp.lt.s32.totalorder %s126_s22, %s2244_s9 }
  0x9e   :  { %p1735_p0 = scmp.ne.s32.totalorder %s126_s22, %s1734_s15  ;;  %p1740_p2 = scmp.lt.s32.totalorder %s2270_s16, %s1734_s15 }
  0xa0   :  { %p1741_p3 = por %p1740_p2, %p1739_p1 }
  0xa2   :  { %p1742_p4 = pnand %p1741_p3, %p1735_p0 }
  0xa4   :  { %1745 = shalt.err (!%p1742_p4)  }
  0xa5   :  { %128 = dma.hbm_to_vmem [thread:$0]  %s121_s23, 48, %s126_s22, [#allocation3 + $0x3], %s2757_s2, %s2757_s2, %s2131_s17 }
  0xa6   :  { %s1233_s12 = sld [smem:[#allocation6 + $0x5]]  ;;  %s2133_s29 = smov [#allocation2 + $0x4]  }
  0xa7   :  { %s140_s4 = sshll.u32 %s2133_s29, 4  ;;  %s2134_s10 = smov [#allocation2 + $0x5]   ;;  %s2330_s4 = int_to_ptr.vmem [resolvable:$true] %s140_s4 }
  0xa8   :  { %s155_s19 = sshll.u32 %s2134_s10, 4  ;;  %s2334_s20 = sld [smem:[#allocation6 + $0x6]]  ;;  %s2332_s19 = int_to_ptr.vmem [resolvable:$true] %s155_s19 }
  0xa9   :  { %s131_s0 = sshrl.u32 %s2319_s18, 3  ;;  %s132_s24 = sand.u32 7, %s2319_s18  }
  0xaa   :  { %s133_s25 = smul.u32 24, %s131_s0  ;;  %s2135_s21 = smov [#allocation2 + $0x6]  }
  0xab   :  { %s2338_s22 = sshll.u32 %s2135_s21, 4  ;;  %s171_s22 = int_to_ptr.vmem [resolvable:$true] %s2338_s22 }
  0xac   :  { %s146_s28 = sshrl.u32 %s1233_s12, 3  ;;  %s147_s11 = sand.u32 7, %s1233_s12  }
  0xad   :  { %s134_s13 = sadd.s32 %s133_s25, %s132_s24  ;;  %s148_s6 = smul.u32 24, %s146_s28 }
  0xae   :  { %s1232_s23 = sshll.u32 %s134_s13, 4 }
  0xaf   :  { %s136_s30 = scalar_lea.hbm %s2749_s1, %s1232_s23  ;;  %s149_s15 = sadd.s32 %s148_s6, %s147_s11 }
  0xb0   :  { %s1746_s29 = scalar_lea.hbm %s136_s30, 48  ;;  %p1749_p6 = scmp.lt.u32.totalorder %s136_s30, %s2749_s1 }
  0xb1   :  { %p1747_p5 = scmp.ne.s32.totalorder %s136_s30, %s1746_s29  ;;  %p1750_p7 = scmp.lt.u32.totalorder %s2261_s14, %s1746_s29 }
  0xb2   :  { %p1752_p9 = scmp.lt.u32.totalorder %s1746_s29, %s136_s30 }
  0xb3   :  { %p1751_p8 = por %p1750_p7, %p1749_p6 }
  0xb5   :  { %p1753_p10 = por %p1752_p9, %p1751_p8 }
  0xb7   :  { %p1754_p11 = pnand %p1753_p10, %p1747_p5 }
  0xb9   :  { %1757 = shalt.err (!%p1754_p11)  }
  0xba   :  { %s1758_s18 = scalar_lea.vmem %s2330_s4, 48  ;;  %p1763_p13 = scmp.lt.s32.totalorder %s2330_s4, %s2244_s9 }
  0xbb   :  { %p1759_p12 = scmp.ne.s32.totalorder %s2330_s4, %s1758_s18  ;;  %p1764_p0 = scmp.lt.s32.totalorder %s2270_s16, %s1758_s18 }
  0xbd   :  { %p1765_p1 = por %p1764_p0, %p1763_p13 }
  0xbf   :  { %p1766_p2 = pnand %p1765_p1, %p1759_p12 }
  0xc1   :  { %1769 = shalt.err (!%p1766_p2)  }
  0xc2   :  { %s2764_s2 = smov 128   ;;  %s1234_s12 = sshll.u32 %s149_s15, 4 }
  0xc3   :  { %143 = dma.hbm_to_vmem [thread:$0]  %s136_s30, 48, %s2330_s4, [#allocation3 + $0x4], %s2764_s2, %s2764_s2, %s2131_s17 }
  0xc4   :  { %s161_s0 = sshrl.u32 %s2334_s20, 3  ;;  %s151_s28 = scalar_lea.hbm %s2749_s1, %s1234_s12 }
  0xc5   :  { %s162_s11 = sand.u32 7, %s2334_s20   ;;  %s1770_s13 = scalar_lea.hbm %s151_s28, 48 }
  0xc6   :  { %p1771_p3 = scmp.ne.s32.totalorder %s151_s28, %s1770_s13  ;;  %p1773_p4 = scmp.lt.u32.totalorder %s151_s28, %s2749_s1 }
  0xc7   :  { %p1774_p5 = scmp.lt.u32.totalorder %s2261_s14, %s1770_s13  ;;  %p1776_p7 = scmp.lt.u32.totalorder %s1770_s13, %s151_s28 }
  0xc9   :  { %p1775_p6 = por %p1774_p5, %p1773_p4 }
  0xcb   :  { %p1777_p8 = por %p1776_p7, %p1775_p6 }
  0xcd   :  { %p1778_p9 = pnand %p1777_p8, %p1771_p3 }
  0xcf   :  { %1781 = shalt.err (!%p1778_p9)  }
  0xd0   :  { %s1782_s4 = scalar_lea.vmem %s2332_s19, 48  ;;  %p1787_p11 = scmp.lt.s32.totalorder %s2332_s19, %s2244_s9 }
  0xd1   :  { %p1783_p10 = scmp.ne.s32.totalorder %s2332_s19, %s1782_s4  ;;  %p1788_p12 = scmp.lt.s32.totalorder %s2270_s16, %s1782_s4 }
  0xd3   :  { %p1789_p13 = por %p1788_p12, %p1787_p11 }
  0xd5   :  { %p1790_p0 = pnand %p1789_p13, %p1783_p10 }
  0xd7   :  { %1793 = shalt.err (!%p1790_p0)  }
  0xd8   :  { %158 = dma.hbm_to_vmem [thread:$0]  %s151_s28, 48, %s2332_s19, [#allocation3 + $0x5], %s2764_s2, %s2764_s2, %s2131_s17 }
  0xd9   :  { %s163_s20 = smul.u32 24, %s161_s0  ;;  %s1237_s21 = sld [smem:[#allocation6 + $0x7]] }
  0xdb   :  { %s164_s26 = sadd.s32 %s163_s20, %s162_s11 }
  0xdc   :  { %s1236_s27 = sshll.u32 %s164_s26, 4 }
  0xdd   :  { %s166_s29 = scalar_lea.hbm %s2749_s1, %s1236_s27 }
  0xde   :  { %s1794_s10 = scalar_lea.hbm %s166_s29, 48  ;;  %p1797_p2 = scmp.lt.u32.totalorder %s166_s29, %s2749_s1 }
  0xdf   :  { %p1795_p1 = scmp.ne.s32.totalorder %s166_s29, %s1794_s10  ;;  %p1798_p3 = scmp.lt.u32.totalorder %s2261_s14, %s1794_s10 }
  0xe0   :  { %p1800_p5 = scmp.lt.u32.totalorder %s1794_s10, %s166_s29 }
  0xe1   :  { %p1799_p4 = por %p1798_p3, %p1797_p2 }
  0xe3   :  { %p1801_p6 = por %p1800_p5, %p1799_p4 }
  0xe5   :  { %p1802_p7 = pnand %p1801_p6, %p1795_p1 }
  0xe7   :  { %1805 = shalt.err (!%p1802_p7)  }
  0xe8   :  { %s1806_s19 = scalar_lea.vmem %s171_s22, 48  ;;  %p1811_p9 = scmp.lt.s32.totalorder %s171_s22, %s2244_s9 }
  0xe9   :  { %p1807_p8 = scmp.ne.s32.totalorder %s171_s22, %s1806_s19  ;;  %p1812_p10 = scmp.lt.s32.totalorder %s2270_s16, %s1806_s19 }
  0xeb   :  { %p1813_p11 = por %p1812_p10, %p1811_p9 }
  0xed   :  { %p1814_p12 = pnand %p1813_p11, %p1807_p8 }
  0xef   :  { %1817 = shalt.err (!%p1814_p12)  }
  0xf0   :  { %173 = dma.hbm_to_vmem [thread:$0]  %s166_s29, 48, %s171_s22, [#allocation3 + $0x6], %s2764_s2, %s2764_s2, %s2131_s17 }
  0xf1   :  { %s2136_s0 = smov [#allocation2 + $0x7]   ;;  %s176_s25 = sshrl.u32 %s1237_s21, 3 }
  0xf2   :  { %s185_s24 = sshll.u32 %s2136_s0, 4  ;;  %s177_s28 = sand.u32 7, %s1237_s21   ;;  %s186_s24 = int_to_ptr.vmem [resolvable:$true] %s185_s24 }
  0xf3   :  { %s178_s11 = smul.u32 24, %s176_s25 }
  0xf5   :  { %s179_s13 = sadd.s32 %s178_s11, %s177_s28 }
  0xf6   :  { %s1238_s6 = sshll.u32 %s179_s13, 4 }
  0xf7   :  { %s181_s20 = scalar_lea.hbm %s2749_s1, %s1238_s6 }
  0xf8   :  { %s1818_s26 = scalar_lea.hbm %s181_s20, 48  ;;  %p1821_p0 = scmp.lt.u32.totalorder %s181_s20, %s2749_s1 }
  0xf9   :  { %p1819_p13 = scmp.ne.s32.totalorder %s181_s20, %s1818_s26  ;;  %p1822_p1 = scmp.lt.u32.totalorder %s2261_s14, %s1818_s26 }
  0xfa   :  { %p1824_p3 = scmp.lt.u32.totalorder %s1818_s26, %s181_s20 }
  0xfb   :  { %p1823_p2 = por %p1822_p1, %p1821_p0 }
  0xfd   :  { %p1825_p4 = por %p1824_p3, %p1823_p2 }
  0xff   :  { %p1826_p5 = pnand %p1825_p4, %p1819_p13 }
 0x101   :  { %1829 = shalt.err (!%p1826_p5)  }
 0x102   :  { %s1830_s22 = scalar_lea.vmem %s186_s24, 48  ;;  %p1835_p7 = scmp.lt.s32.totalorder %s186_s24, %s2244_s9 }
 0x103   :  { %p1831_p6 = scmp.ne.s32.totalorder %s186_s24, %s1830_s22  ;;  %p1836_p8 = scmp.lt.s32.totalorder %s2270_s16, %s1830_s22 }
 0x105   :  { %p1837_p9 = por %p1836_p8, %p1835_p7 }
 0x107   :  { %p1838_p10 = pnand %p1837_p9, %p1831_p6 }
 0x109   :  { %1841 = shalt.err (!%p1838_p10)  }
 0x10a   :  { %188 = dma.hbm_to_vmem [thread:$0]  %s181_s20, 48, %s186_s24, [#allocation3 + $0x7], %s2764_s2, %s2764_s2, %s2131_s17 }
 0x10b   :  { %s2399_s21 = smov 0  }
 0x10c LB: > { %s2405_s15 = sand.u32 1, %s2118_s21  ;;  %s2408_s29 = sadd.s32 1, %s2118_s21   ;;  %s2118_s21 = sphi %s2399_s21, %s2769_s21  }
 0x10d   : > { %p1543_p12 = scmp.lt.s32.totalorder %s2408_s29, 8  ;;  %s1284_s17 = sshll.u32 %s2118_s21, 3 }
 0x10e   : > { %s203_s2 = ssub.s32 1, %s2405_s15  ;;  %s2414_s10 = sadd.s32 8, %s1284_s17 }
 0x10f   : > { %s211_s18 = smul.u32 24, %s203_s2  ;;  %s1242_s0 = sshll.u32 %s203_s2, 3 }
 0x110   : > { %s1519_s12 = scalar_select %p1543_p12, [#allocation6], [#allocation30] }
 0x111   : > { %s1520_s19 = scalar_select %p1543_p12, %s2414_s10, 0 }
 0x112   : > { %s2422_s28 = scalar_lea.vmem [#allocation2], %s211_s18  ;;  %s220_s13 = sadd.s32 1, %s2414_s10 }
 0x113   : > { %s204_s24 = sld [smem:[%s1519_s12 + %s1520_s19]]  ;;  %s216_s11 = sshll.u32 %s2422_s28, 4  ;;  %s2433_s11 = int_to_ptr.vmem [resolvable:$true] %s216_s11 }
 0x114   : > { %s1127_s6 = scalar_lea.vmem %s2422_s28, 1 [#allocation2]  ;;  %s2776_s13 = smov (!%p1543_p12, %s220_s13), 0 }
 0x115   : > { %s1522_s23 = scalar_select %p1543_p12, [#allocation6], [#allocation31] }
 0x116   : > { %s233_s30 = sshll.u32 %s1127_s6, 4  ;;  %s2435_s2 = scalar_lea.sflag [#allocation3], %s1242_s0  ;;  %s2441_s30 = int_to_ptr.vmem [resolvable:$true] %s233_s30 }
 0x117   : > { %s2431_s27 = sld [smem:[%s1522_s23 + %s2776_s13]] }
 0x119   : > { %s205_s4 = sshrl.u32 %s204_s24, 3  ;;  %s206_s20 = sand.u32 7, %s204_s24  }
 0x11a   : > { %s207_s26 = smul.u32 24, %s205_s4 }
 0x11c   : > { %s208_s22 = sadd.s32 %s207_s26, %s206_s20 }
 0x11d   : > { %s1241_s17 = sshll.u32 %s208_s22, 4 }
 0x11e   : > { %s210_s25 = scalar_lea.hbm %s2749_s1, %s1241_s17 }
 0x11f   : > { %s1842_s24 = scalar_lea.hbm %s210_s25, 48  ;;  %p1847_p2 = scmp.lt.u32.totalorder %s210_s25, %s2749_s1 }
 0x120   : > { %p1843_p13 = scmp.ne.s32.totalorder %s210_s25, %s1842_s24  ;;  %p1848_p3 = scmp.lt.u32.totalorder %s2261_s14, %s1842_s24 }
 0x121   : > { %p1850_p5 = scmp.lt.u32.totalorder %s1842_s24, %s210_s25 }
 0x122   : > { %p1844_p0 = pnand %p1843_p13, %p1543_p12  ;;  %p1849_p4 = por %p1848_p3, %p1847_p2 }
 0x124   : > { %p1845_p1 = pneg %p1844_p0  ;;  %p1851_p6 = por %p1850_p5, %p1849_p4 }
 0x126   : > { %p1852_p7 = pnand %p1851_p6, %p1845_p1 }
 0x128   : > { %1855 = shalt.err (!%p1852_p7)  }
 0x129   : > { %s1856_s0 = scalar_lea.vmem %s2433_s11, 48  ;;  %p1863_p13 = scmp.lt.s32.totalorder %s2433_s11, %s2244_s9 }
 0x12a   : > { %p1857_p8 = scmp.ne.s32.totalorder %s2433_s11, %s1856_s0  ;;  %p1864_p0 = scmp.lt.s32.totalorder %s2270_s16, %s1856_s0 }
 0x12c   : > { %p1858_p9 = pnand %p1857_p8, %p1543_p12  ;;  %p1865_p11 = por %p1864_p0, %p1863_p13 }
 0x12e   : > { %p1859_p10 = pneg %p1858_p9 }
 0x130   : > { %p1866_p2 = pnand %p1865_p11, %p1859_p10 }
 0x132   : > { %1869 = shalt.err (!%p1866_p2)  }
 0x133   : > { %s2137_s23 = smov 128   ;;  %s2138_s4 = smov 1  }
 0x134   : > { %1521 = dma.hbm_to_vmem [thread:$0]  (%p1543_p12), %s210_s25, 48, %s2433_s11, %s2435_s2, %s2137_s23, %s2137_s23, %s2138_s4 }
 0x135   : > { %s222_s20 = sshrl.u32 %s2431_s27, 3  ;;  %s223_s26 = sand.u32 7, %s2431_s27  }
 0x136   : > { %s224_s22 = smul.u32 24, %s222_s20  ;;  %s1137_s17 = scalar_lea.vmem %s2422_s28, 2 [#allocation2] }
 0x137   : > { %s2468_s12 = scalar_select %p1543_p12, [#allocation6], [#allocation32] }
 0x138   : > { %s225_s19 = sadd.s32 %s224_s22, %s223_s26  ;;  %s237_s24 = sadd.s32 2, %s2414_s10 }
 0x139   : > { %s1243_s13 = sshll.u32 %s225_s19, 4  ;;  %s2471_s6 = sshll.u32 %s1137_s17, 4  ;;  %s2510_s6 = int_to_ptr.vmem [resolvable:$true] %s2471_s6 }
 0x13a   : > { %s227_s8 = scalar_lea.hbm %s2749_s1, %s1243_s13  ;;  %s254_s7 = sadd.s32 3, %s2414_s10 }
 0x13b   : > { %s1870_s5 = scalar_lea.hbm %s227_s8, 48  ;;  %p1875_p4 = scmp.lt.u32.totalorder %s227_s8, %s2749_s1 }
 0x13c   : > { %p1871_p11 = scmp.ne.s32.totalorder %s227_s8, %s1870_s5  ;;  %p1876_p5 = scmp.lt.u32.totalorder %s2261_s14, %s1870_s5 }
 0x13d   : > { %p1878_p7 = scmp.lt.u32.totalorder %s1870_s5, %s227_s8 }
 0x13e   : > { %p1872_p1 = pnand %p1871_p11, %p1543_p12  ;;  %p1877_p6 = por %p1876_p5, %p1875_p4 }
 0x140   : > { %p1873_p3 = pneg %p1872_p1  ;;  %p1879_p8 = por %p1878_p7, %p1877_p6 }
 0x142   : > { %p1880_p9 = pnand %p1879_p8, %p1873_p3 }
 0x144   : > { %1883 = shalt.err (!%p1880_p9)  }
 0x145   : > { %s1884_s27 = scalar_lea.vmem %s2441_s30, 48  ;;  %p1891_p2 = scmp.lt.s32.totalorder %s2441_s30, %s2244_s9 }
 0x146   : > { %p1885_p10 = scmp.ne.s32.totalorder %s2441_s30, %s1884_s27  ;;  %p1892_p11 = scmp.lt.s32.totalorder %s2270_s16, %s1884_s27 }
 0x148   : > { %p1886_p13 = pnand %p1885_p10, %p1543_p12  ;;  %p1893_p1 = por %p1892_p11, %p1891_p2 }
 0x14a   : > { %p1887_p0 = pneg %p1886_p13 }
 0x14c   : > { %p1894_p4 = pnand %p1893_p1, %p1887_p0 }
 0x14e   : > { %1897 = shalt.err (!%p1894_p4)  }
 0x14f   : > { %s2765_s5 = scalar_lea.sflag %s2435_s2, 1 [#allocation3]  ;;  %s2778_s24 = smov (!%p1543_p12, %s237_s24), 0 }
 0x150   : > { %1524 = dma.hbm_to_vmem [thread:$0]  (%p1543_p12), %s227_s8, 48, %s2441_s30, %s2765_s5, %s2137_s23, %s2137_s23, %s2138_s4 }
 0x151   : > { %s1528_s18 = scalar_select %p1543_p12, [#allocation6], [#allocation33] }
 0x152   : > { %s238_s20 = sld [smem:[%s2468_s12 + %s2778_s24]]  ;;  %s1147_s26 = scalar_lea.vmem %s2422_s28, 3 [#allocation2] }
 0x153   : > { %s2780_s7 = smov (!%p1543_p12, %s254_s7), 0  ;;  %s267_s13 = sshll.u32 %s1147_s26, 4  ;;  %s2520_s13 = int_to_ptr.vmem [resolvable:$true] %s267_s13 }
 0x154   : > { %s2512_s17 = sld [smem:[%s1528_s18 + %s2780_s7]]  ;;  %s271_s8 = sadd.s32 4, %s2414_s10 }
 0x155   : > { %s2518_s30 = scalar_select %p1543_p12, [#allocation6], [#allocation34] }
 0x156   : > { %s2782_s8 = smov (!%p1543_p12, %s271_s8), 0 }
 0x158   : > { %s239_s0 = sshrl.u32 %s238_s20, 3  ;;  %s240_s12 = sand.u32 7, %s238_s20  }
 0x159   : > { %s241_s24 = smul.u32 24, %s239_s0 }
 0x15a   : > { %s256_s25 = sshrl.u32 %s2512_s17, 3  ;;  %s257_s27 = sand.u32 7, %s2512_s17  }
 0x15b   : > { %s242_s7 = sadd.s32 %s241_s24, %s240_s12  ;;  %s258_s19 = smul.u32 24, %s256_s25 }
 0x15c   : > { %s1245_s11 = sshll.u32 %s242_s7, 4 }
 0x15d   : > { %s244_s26 = scalar_lea.hbm %s2749_s1, %s1245_s11 }
 0x15e   : > { %s1898_s22 = scalar_lea.hbm %s244_s26, 48  ;;  %p1903_p7 = scmp.lt.u32.totalorder %s244_s26, %s2749_s1 }
 0x15f   : > { %p1899_p3 = scmp.ne.s32.totalorder %s244_s26, %s1898_s22  ;;  %p1904_p8 = scmp.lt.u32.totalorder %s2261_s14, %s1898_s22 }
 0x160   : > { %p1906_p10 = scmp.lt.u32.totalorder %s1898_s22, %s244_s26 }
 0x161   : > { %p1900_p5 = pnand %p1899_p3, %p1543_p12  ;;  %p1905_p9 = por %p1904_p8, %p1903_p7 }
 0x163   : > { %p1901_p6 = pneg %p1900_p5  ;;  %p1907_p13 = por %p1906_p10, %p1905_p9 }
 0x165   : > { %p1908_p0 = pnand %p1907_p13, %p1901_p6 }
 0x167   : > { %1911 = shalt.err (!%p1908_p0)  }
 0x168   : > { %s1912_s17 = scalar_lea.vmem %s2510_s6, 48  ;;  %p1919_p4 = scmp.lt.s32.totalorder %s2510_s6, %s2244_s9 }
 0x169   : > { %p1913_p2 = scmp.ne.s32.totalorder %s2510_s6, %s1912_s17  ;;  %p1920_p3 = scmp.lt.s32.totalorder %s2270_s16, %s1912_s17 }
 0x16b   : > { %p1914_p11 = pnand %p1913_p2, %p1543_p12  ;;  %p1921_p5 = por %p1920_p3, %p1919_p4 }
 0x16d   : > { %p1915_p1 = pneg %p1914_p11 }
 0x16f   : > { %p1922_p7 = pnand %p1921_p5, %p1915_p1 }
 0x171   : > { %1925 = shalt.err (!%p1922_p7)  }
 0x172   : > { %s2766_s22 = scalar_lea.sflag %s2435_s2, 2 [#allocation3]  ;;  %s259_s12 = sadd.s32 %s258_s19, %s257_s27 }
 0x173   : > { %1527 = dma.hbm_to_vmem [thread:$0]  (%p1543_p12), %s244_s26, 48, %s2510_s6, %s2766_s22, %s2137_s23, %s2137_s23, %s2138_s4 }
 0x174   : > { %s2554_s24 = sld [smem:[%s2518_s30 + %s2782_s8]]  ;;  %s1247_s7 = sshll.u32 %s259_s12, 4 }
 0x175   : > { %s1157_s25 = scalar_lea.vmem %s2422_s28, 4 [#allocation2]  ;;  %s261_s18 = scalar_lea.hbm %s2749_s1, %s1247_s7 }
 0x176   : > { %s1160_s20 = scalar_lea.sflag %s2435_s2, 4 [#allocation3]  ;;  %s1926_s0 = scalar_lea.hbm %s261_s18, 48 }
 0x177   : > { %p1927_p6 = scmp.ne.s32.totalorder %s261_s18, %s1926_s0  ;;  %p1931_p10 = scmp.lt.u32.totalorder %s261_s18, %s2749_s1 }
 0x178   : > { %p1932_p13 = scmp.lt.u32.totalorder %s2261_s14, %s1926_s0  ;;  %p1934_p2 = scmp.lt.u32.totalorder %s1926_s0, %s261_s18 }
 0x179   : > { %p1928_p8 = pnand %p1927_p6, %p1543_p12 }
 0x17a   : > { %p1933_p0 = por %p1932_p13, %p1931_p10 }
 0x17b   : > { %p1929_p9 = pneg %p1928_p8 }
 0x17c   : > { %p1935_p11 = por %p1934_p2, %p1933_p0 }
 0x17e   : > { %p1936_p1 = pnand %p1935_p11, %p1929_p9 }
 0x180   : > { %1939 = shalt.err (!%p1936_p1)  }
 0x181   : > { %s1940_s6 = scalar_lea.vmem %s2520_s13, 48  ;;  %p1947_p7 = scmp.lt.s32.totalorder %s2520_s13, %s2244_s9 }
 0x182   : > { %p1941_p4 = scmp.ne.s32.totalorder %s2520_s13, %s1940_s6  ;;  %p1948_p6 = scmp.lt.s32.totalorder %s2270_s16, %s1940_s6 }
 0x184   : > { %p1942_p3 = pnand %p1941_p4, %p1543_p12  ;;  %p1949_p8 = por %p1948_p6, %p1947_p7 }
 0x186   : > { %p1943_p5 = pneg %p1942_p3 }
 0x188   : > { %p1950_p10 = pnand %p1949_p8, %p1943_p5 }
 0x18a   : > { %1953 = shalt.err (!%p1950_p10)  }
 0x18b   : > { %s2767_s3 = scalar_lea.sflag %s2435_s2, 3 [#allocation3]  ;;  %s284_s19 = sshll.u32 %s1157_s25, 4  ;;  %s2587_s19 = int_to_ptr.vmem [resolvable:$true] %s284_s19 }
 0x18c   : > { %1530 = dma.hbm_to_vmem [thread:$0]  (%p1543_p12), %s261_s18, 48, %s2520_s13, %s2767_s3, %s2137_s23, %s2137_s23, %s2138_s4 }
 0x18d   : > { %s288_s8 = sadd.s32 5, %s2414_s10  ;;  %s273_s27 = sshrl.u32 %s2554_s24, 3 }
 0x18e   : > { %s1534_s30 = scalar_select %p1543_p12, [#allocation6], [#allocation35] }
 0x18f   : > { %s274_s26 = sand.u32 7, %s2554_s24   ;;  %s275_s22 = smul.u32 24, %s273_s27 }
 0x190   : > { %s2784_s8 = smov (!%p1543_p12, %s288_s8), 0  ;;  %s1167_s7 = scalar_lea.vmem %s2422_s28, 5 [#allocation2] }
 0x191   : > { %s276_s12 = sadd.s32 %s275_s22, %s274_s26  ;;  %s2592_s5 = sld [smem:[%s1534_s30 + %s2784_s8]] }
 0x192   : > { %s1249_s11 = sshll.u32 %s276_s12, 4 }
 0x193   : > { %s278_s25 = scalar_lea.hbm %s2749_s1, %s1249_s11 }
 0x194   : > { %s1954_s18 = scalar_lea.hbm %s278_s25, 48  ;;  %p1959_p2 = scmp.lt.u32.totalorder %s278_s25, %s2749_s1 }
 0x195   : > { %p1955_p9 = scmp.ne.s32.totalorder %s278_s25, %s1954_s18  ;;  %p1960_p11 = scmp.lt.u32.totalorder %s2261_s14, %s1954_s18 }
 0x196   : > { %p1962_p4 = scmp.lt.u32.totalorder %s1954_s18, %s278_s25 }
 0x197   : > { %p1956_p13 = pnand %p1955_p9, %p1543_p12  ;;  %p1961_p1 = por %p1960_p11, %p1959_p2 }
 0x199   : > { %p1957_p0 = pneg %p1956_p13  ;;  %p1963_p3 = por %p1962_p4, %p1961_p1 }
 0x19b   : > { %p1964_p5 = pnand %p1963_p3, %p1957_p0 }
 0x19d   : > { %1967 = shalt.err (!%p1964_p5)  }
 0x19e   : > { %s1968_s6 = scalar_lea.vmem %s2587_s19, 48  ;;  %p1975_p10 = scmp.lt.s32.totalorder %s2587_s19, %s2244_s9 }
 0x19f   : > { %p1969_p7 = scmp.ne.s32.totalorder %s2587_s19, %s1968_s6  ;;  %p1976_p9 = scmp.lt.s32.totalorder %s2270_s16, %s1968_s6 }
 0x1a1   : > { %p1970_p6 = pnand %p1969_p7, %p1543_p12  ;;  %p1977_p13 = por %p1976_p9, %p1975_p10 }
 0x1a3   : > { %p1971_p8 = pneg %p1970_p6 }
 0x1a5   : > { %p1978_p2 = pnand %p1977_p13, %p1971_p8 }
 0x1a7   : > { %1981 = shalt.err (!%p1978_p2)  }
 0x1a8   : > { %1533 = dma.hbm_to_vmem [thread:$0]  (%p1543_p12), %s278_s25, 48, %s2587_s19, %s1160_s20, %s2137_s23, %s2137_s23, %s2138_s4 }
 0x1a9   : > { %s301_s3 = sshll.u32 %s1167_s7, 4  ;;  %s305_s8 = sadd.s32 6, %s2414_s10  ;;  %s302_s3 = int_to_ptr.vmem [resolvable:$true] %s301_s3 }
 0x1aa   : > { %s1537_s30 = scalar_select %p1543_p12, [#allocation6], [#allocation36] }
 0x1ab   : > { %s2786_s8 = smov (!%p1543_p12, %s305_s8), 0  ;;  %s290_s27 = sshrl.u32 %s2592_s5, 3 }
 0x1ac   : > { %s291_s26 = sand.u32 7, %s2592_s5   ;;  %s292_s22 = smul.u32 24, %s290_s27 }
 0x1ad   : > { %s2627_s12 = sld [smem:[%s1537_s30 + %s2786_s8]]  ;;  %s1170_s11 = scalar_lea.sflag %s2435_s2, 5 [#allocation3] }
 0x1ae   : > { %s1177_s0 = scalar_lea.vmem %s2422_s28, 6 [#allocation2]  ;;  %s293_s13 = sadd.s32 %s292_s22, %s291_s26 }
 0x1af   : > { %s1251_s18 = sshll.u32 %s293_s13, 4  ;;  %s318_s25 = sshll.u32 %s1177_s0, 4  ;;  %s319_s25 = int_to_ptr.vmem [resolvable:$true] %s318_s25 }
 0x1b0   : > { %s295_s7 = scalar_lea.hbm %s2749_s1, %s1251_s18 }
 0x1b1   : > { %s1982_s24 = scalar_lea.hbm %s295_s7, 48  ;;  %p1987_p4 = scmp.lt.u32.totalorder %s295_s7, %s2749_s1 }
 0x1b2   : > { %p1983_p0 = scmp.ne.s32.totalorder %s295_s7, %s1982_s24  ;;  %p1988_p3 = scmp.lt.u32.totalorder %s2261_s14, %s1982_s24 }
 0x1b3   : > { %p1990_p7 = scmp.lt.u32.totalorder %s1982_s24, %s295_s7 }
 0x1b4   : > { %p1984_p11 = pnand %p1983_p0, %p1543_p12  ;;  %p1989_p5 = por %p1988_p3, %p1987_p4 }
 0x1b6   : > { %p1985_p1 = pneg %p1984_p11  ;;  %p1991_p6 = por %p1990_p7, %p1989_p5 }
 0x1b8   : > { %p1992_p8 = pnand %p1991_p6, %p1985_p1 }
 0x1ba   : > { %1995 = shalt.err (!%p1992_p8)  }
 0x1bb   : > { %s1996_s6 = scalar_lea.vmem %s302_s3, 48  ;;  %p2003_p2 = scmp.lt.s32.totalorder %s302_s3, %s2244_s9 }
 0x1bc   : > { %p1997_p10 = scmp.ne.s32.totalorder %s302_s3, %s1996_s6  ;;  %p2004_p0 = scmp.lt.s32.totalorder %s2270_s16, %s1996_s6 }
 0x1be   : > { %p1998_p9 = pnand %p1997_p10, %p1543_p12  ;;  %p2005_p11 = por %p2004_p0, %p2003_p2 }
 0x1c0   : > { %p1999_p13 = pneg %p1998_p9 }
 0x1c2   : > { %p2006_p3 = pnand %p2005_p11, %p1999_p13 }
 0x1c4   : > { %2009 = shalt.err (!%p2006_p3)  }
 0x1c5   : > { %1536 = dma.hbm_to_vmem [thread:$0]  (%p1543_p12), %s295_s7, 48, %s302_s3, %s1170_s11, %s2137_s23, %s2137_s23, %s2138_s4 }
 0x1c6   : > { %s307_s8 = sshrl.u32 %s2627_s12, 3  ;;  %s308_s30 = sand.u32 7, %s2627_s12  }
 0x1c7   : > { %s309_s27 = smul.u32 24, %s307_s8  ;;  %s1180_s26 = scalar_lea.sflag %s2435_s2, 6 [#allocation3] }
 0x1c8   : > { %s2656_s22 = scalar_select %p1543_p12, [#allocation6], [#allocation37] }
 0x1c9   : > { %s310_s0 = sadd.s32 %s309_s27, %s308_s30  ;;  %s322_s18 = sadd.s32 7, %s2414_s10 }
 0x1ca   : > { %s1253_s13 = sshll.u32 %s310_s0, 4 }
 0x1cb   : > { %s312_s24 = scalar_lea.hbm %s2749_s1, %s1253_s13 }
 0x1cc   : > { %s2010_s17 = scalar_lea.hbm %s312_s24, 48  ;;  %p2015_p7 = scmp.lt.u32.totalorder %s312_s24, %s2749_s1 }
 0x1cd   : > { %p2011_p1 = scmp.ne.s32.totalorder %s312_s24, %s2010_s17  ;;  %p2016_p6 = scmp.lt.u32.totalorder %s2261_s14, %s2010_s17 }
 0x1ce   : > { %p2018_p10 = scmp.lt.u32.totalorder %s2010_s17, %s312_s24 }
 0x1cf   : > { %p2012_p4 = pnand %p2011_p1, %p1543_p12  ;;  %p2017_p8 = por %p2016_p6, %p2015_p7 }
 0x1d1   : > { %p2013_p5 = pneg %p2012_p4  ;;  %p2019_p9 = por %p2018_p10, %p2017_p8 }
 0x1d3   : > { %p2020_p13 = pnand %p2019_p9, %p2013_p5 }
 0x1d5   : > { %2023 = shalt.err (!%p2020_p13)  }
 0x1d6   : > { %s2024_s10 = scalar_lea.vmem %s319_s25, 48  ;;  %p2031_p3 = scmp.lt.s32.totalorder %s319_s25, %s2244_s9 }
 0x1d7   : > { %p2025_p2 = scmp.ne.s32.totalorder %s319_s25, %s2024_s10  ;;  %p2032_p1 = scmp.lt.s32.totalorder %s2270_s16, %s2024_s10 }
 0x1d9   : > { %p2026_p0 = pnand %p2025_p2, %p1543_p12  ;;  %p2033_p4 = por %p2032_p1, %p2031_p3 }
 0x1db   : > { %p2027_p11 = pneg %p2026_p0 }
 0x1dd   : > { %p2034_p6 = pnand %p2033_p4, %p2027_p11 }
 0x1df   : > { %2037 = shalt.err (!%p2034_p6)  }
 0x1e0   : > { %1539 = dma.hbm_to_vmem [thread:$0]  (%p1543_p12), %s312_s24, 48, %s319_s25, %s1180_s26, %s2137_s23, %s2137_s23, %s2138_s4 }
 0x1e1   : > { %s2788_s18 = smov (!%p1543_p12, %s322_s18), 0  ;;  %s1187_s7 = scalar_lea.vmem %s2422_s28, 7 [#allocation2] }
 0x1e2   : > { %s323_s11 = sld [smem:[%s2656_s22 + %s2788_s18]]  ;;  %s335_s5 = sshll.u32 %s1187_s7, 4  ;;  %s336_s5 = int_to_ptr.vmem [resolvable:$true] %s335_s5 }
 0x1e3   : > { %s1190_s27 = scalar_lea.sflag %s2435_s2, 7 [#allocation3] }
 0x1e8   : > { %s324_s6 = sshrl.u32 %s323_s11, 3  ;;  %s325_s8 = sand.u32 7, %s323_s11  }
 0x1e9   : > { %s326_s30 = smul.u32 24, %s324_s6 }
 0x1eb   : > { %s327_s0 = sadd.s32 %s326_s30, %s325_s8 }
 0x1ec   : > { %s1255_s13 = sshll.u32 %s327_s0, 4 }
 0x1ed   : > { %s329_s17 = scalar_lea.hbm %s2749_s1, %s1255_s13 }
 0x1ee   : > { %s2038_s3 = scalar_lea.hbm %s329_s17, 48  ;;  %p2043_p10 = scmp.lt.u32.totalorder %s329_s17, %s2749_s1 }
 0x1ef   : > { %p2039_p5 = scmp.ne.s32.totalorder %s329_s17, %s2038_s3  ;;  %p2044_p9 = scmp.lt.u32.totalorder %s2261_s14, %s2038_s3 }
 0x1f0   : > { %p2046_p2 = scmp.lt.u32.totalorder %s2038_s3, %s329_s17 }
 0x1f1   : > { %p2040_p7 = pnand %p2039_p5, %p1543_p12  ;;  %p2045_p13 = por %p2044_p9, %p2043_p10 }
 0x1f3   : > { %p2041_p8 = pneg %p2040_p7  ;;  %p2047_p0 = por %p2046_p2, %p2045_p13 }
 0x1f5   : > { %p2048_p11 = pnand %p2047_p0, %p2041_p8 }
 0x1f7   : > { %2051 = shalt.err (!%p2048_p11)  }
 0x1f8   : > { %s2052_s28 = scalar_lea.vmem %s336_s5, 48  ;;  %p2059_p6 = scmp.lt.s32.totalorder %s336_s5, %s2244_s9 }
 0x1f9   : > { %p2053_p3 = scmp.ne.s32.totalorder %s336_s5, %s2052_s28  ;;  %p2060_p5 = scmp.lt.s32.totalorder %s2270_s16, %s2052_s28 }
 0x1fb   : > { %p2054_p1 = pnand %p2053_p3, %p1543_p12  ;;  %p2061_p7 = por %p2060_p5, %p2059_p6 }
 0x1fd   : > { %p2055_p4 = pneg %p2054_p1 }
 0x1ff   : > { %p2062_p9 = pnand %p2061_p7, %p2055_p4 }
 0x201   : > { %2065 = shalt.err (!%p2062_p9)  }
 0x202   : > { %1542 = dma.hbm_to_vmem [thread:$0]  (%p1543_p12), %s329_s17, 48, %s336_s5, %s1190_s27, %s2137_s23, %s2137_s23, %s2138_s4 }
 0x203   : > { %s2768_s22 = sshll.u32 %s2405_s15, 3 }
 0x204   : > { %s340_s18 = scalar_lea.sflag [#allocation3], %s2768_s22 }
 0x205   : > { %2098 = dma.done.wait %s340_s18, 48 }
 0x206   : > { %2099 = vsyncadd %s340_s18, 4294967248  ;;  %s1195_s24 = scalar_lea.sflag %s340_s18, 1 [#allocation3] }
 0x207   : > { %2100 = dma.done.wait %s1195_s24, 48 }
 0x208   : > { %2101 = vsyncadd %s1195_s24, 4294967248  ;;  %s1198_s12 = scalar_lea.sflag %s340_s18, 2 [#allocation3] }
 0x209   : > { %2102 = dma.done.wait %s1198_s12, 48 }
 0x20a   : > { %2103 = vsyncadd %s1198_s12, 4294967248  ;;  %s1201_s10 = scalar_lea.sflag %s340_s18, 3 [#allocation3] }
 0x20b   : > { %2104 = dma.done.wait %s1201_s10, 48 }
 0x20c   : > { %2105 = vsyncadd %s1201_s10, 4294967248  ;;  %s1204_s11 = scalar_lea.sflag %s340_s18, 4 [#allocation3] }
 0x20d   : > { %2106 = dma.done.wait %s1204_s11, 48 }
 0x20e   : > { %2107 = vsyncadd %s1204_s11, 4294967248  ;;  %s1207_s7 = scalar_lea.sflag %s340_s18, 5 [#allocation3] }
 0x20f   : > { %2108 = dma.done.wait %s1207_s7, 48 }
 0x210   : > { %2109 = vsyncadd %s1207_s7, 4294967248  ;;  %s1210_s2 = scalar_lea.sflag %s340_s18, 6 [#allocation3] }
 0x211   : > { %2110 = dma.done.wait %s1210_s2, 48 }
 0x212   : > { %2111 = vsyncadd %s1210_s2, 4294967248  ;;  %s1213_s23 = scalar_lea.sflag %s340_s18, 7 [#allocation3] }
 0x213   : > { %2112 = dma.done.wait %s1213_s23, 48 }
 0x214   : > { %2113 = vsyncadd %s1213_s23, 4294967248  ;;  %s1286_s4 = smul.u32 24, %s2405_s15  ;;  %v403_v3 = vlaneseq  ;;  %v2139_v7 = vmov 1966171168   ;;  %s427_s15 = sshra.s32 %s2118_s21, 3 }
 0x215   : > { %v401_v8 = vunpack.c.l.s4 %v2139_v7  ;;  %s1266_s6 = smul.u32 24, %s427_s15  ;;  %s430_s8 = sand.u32 7, %s2118_s21 }
 0x216   : > { %s374_s5 = scalar_lea.vmem [#allocation2], %s1286_s4  ;;  %v2707_v12 = vshrl.u32 %v403_v3, 7  ;;  %vm425_vm0 = vcmp.lt.s32.totalorder %v403_v3, 384  ;;  %s2769_s21 = smov %s2408_s29 }
 0x217   : > { %v375_v0 = vld [vmem:[%s374_s5] sm:$0xff]  ;;  %v376_v1 = vld [vmem:[%s374_s5 + $0x8] sm:$0xff]  ;;  %v377_v2 = vld [vmem:[%s374_s5 + $0x10] sm:$0xff]  ;;  %v402_v16 = vunpack.c.0.s8 %v401_v8  ;;  %s433_s30 = sadd.s32 %s1266_s6, %s430_s8  ;;  %p2770_p12 = scmp.ge.s32.totalorder %s2408_s29, 8 }
 0x218   : > { %v378_v4 = vrot.slane %v375_v0, 4  ;;  %v384_v5 = vrot.slane %v376_v1, 4  ;;  %v390_v6 = vrot.slane %v377_v2, 4  ;;  %s434_s27 = scalar_lea.vmem [#allocation4], %s433_s30  ;;  %v444_v32 = vld [vmem:[#allocation7 + $0x8] sm:$0xff] (%p2770_p12)  ;;  %v446_v33 = vld [vmem:[#allocation7 + $0x18] sm:$0xff] (%p2770_p12) }
 0x219   : > { %v405_v23 = vsub.s32 %v402_v16, %v2707_v12  ;;  %v443_v34 = vld [vmem:[#allocation7] sm:$0xff] (%p2770_p12)  ;;  %v1322_v35 = vpack.c.bf16 (%p2770_p12), %v446_v33, %v444_v32  ;;  %v445_v36 = vld [vmem:[#allocation7 + $0x10] sm:$0xff] (%p2770_p12)  ;;  %v448_v37 = vld [vmem:[#allocation7 + $0x28] sm:$0xff] (%p2770_p12)  ;;  %s2771_s14 = sld [smem:[#allocation50_spill]] (%p2770_p12)  ;;  %s2772_s29 = sld [smem:[#allocation51_spill]] (%p2770_p12) }
 0x21a   : > { %v379_v9 = vadd.f32 %v378_v4, %v375_v0  ;;  %v385_v10 = vadd.f32 %v384_v5, %v376_v1  ;;  %v391_v11 = vadd.f32 %v390_v6, %v377_v2  ;;  %v450_v38 = vld [vmem:[#allocation7 + $0x38] sm:$0xff] (%p2770_p12)  ;;  %v1324_v39 = vpack.c.bf16 (%p2770_p12), %v445_v36, %v443_v34  ;;  %v447_v41 = vld [vmem:[#allocation7 + $0x20] sm:$0xff] (%p2770_p12)  ;;  %v449_v42 = vld [vmem:[#allocation7 + $0x30] sm:$0xff] (%p2770_p12)  ;;  %s2773_s20 = sld [smem:[#allocation52_spill]] (%p2770_p12)  ;;  %s2141_s19 = smov (%p2770_p12), [#allocation13]  }
 0x21b   :  { %v1326_v40 = vpack.c.bf16 (%p2770_p12), %v450_v38, %v448_v37  ;;  %v452_v43 = vld [vmem:[#allocation7 + $0x48] sm:$0xff] (%p2770_p12)  ;;  %1323 = vmatprep.subr.bf16.mxu0 (%p2770_p12), %v1322_v35  ;;  %v454_v44 = vld [vmem:[#allocation7 + $0x58] sm:$0xff] (%p2770_p12)  ;;  %v1328_v45 = vpack.c.bf16 (%p2770_p12), %v449_v42, %v447_v41  ;;  %v451_v47 = vld [vmem:[#allocation7 + $0x40] sm:$0xff] (%p2770_p12)  ;;  %s960_s17 = sshll.u32 (%p2770_p12), %s2141_s19, 4  ;;  %s961_s17 = int_to_ptr.vmem [resolvable:$true] %s960_s17 }
 0x21c   : > { %v380_v13 = vrot.slane %v379_v9, 2  ;;  %v386_v14 = vrot.slane %v385_v10, 2  ;;  %v392_v15 = vrot.slane %v391_v11, 2  ;;  %1325 = vmatpush1.bf16.msra.mxu0 (%p2770_p12), %v1324_v39  ;;  %v1330_v46 = vpack.c.bf16 (%p2770_p12), %v454_v44, %v452_v43  ;;  %v453_v48 = vld [vmem:[#allocation7 + $0x50] sm:$0xff] (%p2770_p12)  ;;  %v456_v49 = vld [vmem:[#allocation7 + $0x68] sm:$0xff] (%p2770_p12)  ;;  %v458_v50 = vld [vmem:[#allocation7 + $0x78] sm:$0xff] (%p2770_p12)  ;;  %p2071_p10 = scmp.lt.s32.totalorder (%p2770_p12), %s961_s17, %s961_s17 }
 0x21d   :  { %1327 = vmatprep.subr.bf16.mxu0 (%p2770_p12), %v1326_v40  ;;  %v1332_v51 = vpack.c.bf16 (%p2770_p12), %v453_v48, %v451_v47  ;;  %v1334_v52 = vpack.c.bf16 (%p2770_p12), %v458_v50, %v456_v49  ;;  %v455_v53 = vld [vmem:[#allocation7 + $0x60] sm:$0xff] (%p2770_p12)  ;;  %v457_v54 = vld [vmem:[#allocation7 + $0x70] sm:$0xff] (%p2770_p12)  ;;  %v460_v55 = vld [vmem:[#allocation7 + $0x88] sm:$0xff] (%p2770_p12)  ;;  %s2066_s3 = scalar_lea.vmem (%p2770_p12), %s961_s17, 128 }
 0x21e   : > { %v381_v17 = vadd.f32 %v380_v13, %v379_v9  ;;  %v387_v18 = vadd.f32 %v386_v14, %v385_v10  ;;  %v393_v19 = vadd.f32 %v392_v15, %v391_v11  ;;  %v462_v56 = vld [vmem:[#allocation7 + $0x98] sm:$0xff] (%p2770_p12)  ;;  %v1336_v57 = vpack.c.bf16 (%p2770_p12), %v457_v54, %v455_v53  ;;  %v459_v59 = vld [vmem:[#allocation7 + $0x80] sm:$0xff] (%p2770_p12)  ;;  %v461_v60 = vld [vmem:[#allocation7 + $0x90] sm:$0xff] (%p2770_p12)  ;;  %p2067_p8 = scmp.ne.s32.totalorder (%p2770_p12), %s961_s17, %s2066_s3  ;;  %p2072_p13 = scmp.lt.s32.totalorder (%p2770_p12), %s2066_s3, %s2066_s3 }
 0x21f   :  { %v1338_v58 = vpack.c.bf16 (%p2770_p12), %v462_v56, %v460_v55  ;;  %v464_v61 = vld [vmem:[#allocation7 + $0xa8] sm:$0xff] (%p2770_p12)  ;;  %v466_v62 = vld [vmem:[#allocation7 + $0xb8] sm:$0xff] (%p2770_p12)  ;;  %v1340_v63 = vpack.c.bf16 (%p2770_p12), %v461_v60, %v459_v59  ;;  %v463_v1 = vld [vmem:[#allocation7 + $0xa0] sm:$0xff] (%p2770_p12) }
 0x220   : > { %v382_v20 = vrot.slane %v381_v17, 1  ;;  %v388_v21 = vrot.slane %v387_v18, 1  ;;  %v394_v22 = vrot.slane %v393_v19, 1  ;;  %1329 = vmatpush1.bf16.msra.mxu0 (%p2770_p12), %v1328_v45  ;;  %v1342_v0 = vpack.c.bf16 (%p2770_p12), %v466_v62, %v464_v61  ;;  %v465_v2 = vld [vmem:[#allocation7 + $0xb0] sm:$0xff] (%p2770_p12)  ;;  %v468_v3 = vld [vmem:[#allocation7 + $0xc8] sm:$0xff] (%p2770_p12)  ;;  %v470_v4 = vld [vmem:[#allocation7 + $0xd8] sm:$0xff] (%p2770_p12)  ;;  %p2073_p2 = por (%p2770_p12), %p2072_p13, %p2071_p10 }
 0x221   :  { %1331 = vmatprep.subr.bf16.mxu0 (%p2770_p12), %v1330_v46  ;;  %v1344_v5 = vpack.c.bf16 (%p2770_p12), %v465_v2, %v463_v1  ;;  %v1346_v6 = vpack.c.bf16 (%p2770_p12), %v470_v4, %v468_v3  ;;  %v467_v7 = vld [vmem:[#allocation7 + $0xc0] sm:$0xff] (%p2770_p12)  ;;  %v469_v8 = vld [vmem:[#allocation7 + $0xd0] sm:$0xff] (%p2770_p12)  ;;  %v472_v10 = vld [vmem:[#allocation7 + $0xe8] sm:$0xff] (%p2770_p12) }
 0x222   : > { %v383_v24 = vadd.f32 %v382_v20, %v381_v17  ;;  %v389_v25 = vadd.f32 %v388_v21, %v387_v18  ;;  %v395_v26 = vadd.f32 %v394_v22, %v393_v19  ;;  %v474_v11 = vld [vmem:[#allocation7 + $0xf8] sm:$0xff] (%p2770_p12)  ;;  %v1348_v14 = vpack.c.bf16 (%p2770_p12), %v469_v8, %v467_v7  ;;  %v471_v16 = vld [vmem:[#allocation7 + $0xe0] sm:$0xff] (%p2770_p12)  ;;  %v473_v17 = vld [vmem:[#allocation7 + $0xf0] sm:$0xff] (%p2770_p12)  ;;  %p2074_p0 = pnand (%p2770_p12), %p2073_p2, %p2067_p8 }
 0x223   :  { %v1350_v15 = vpack.c.bf16 (%p2770_p12), %v474_v11, %v472_v10  ;;  %v476_v18 = vld [vmem:[#allocation7 + $0x108] sm:$0xff] (%p2770_p12)  ;;  %v478_v19 = vld [vmem:[#allocation7 + $0x118] sm:$0xff] (%p2770_p12)  ;;  %v1352_v20 = vpack.c.bf16 (%p2770_p12), %v473_v17, %v471_v16  ;;  %v475_v22 = vld [vmem:[#allocation7 + $0x100] sm:$0xff] (%p2770_p12) }
 0x224   : > { %v399_v27 = vcombine.low %v383_v24, %v389_v25  ;;  %v413_v28 = vrot.slane %v395_v26, %v405_v23  ;;  %1333 = vmatpush1.bf16.msra.mxu0 (%p2770_p12), %v1332_v51  ;;  %v1354_v21 = vpack.c.bf16 (%p2770_p12), %v478_v19, %v476_v18  ;;  %v480_v24 = vld [vmem:[#allocation7 + $0x128] sm:$0xff] (%p2770_p12)  ;;  %v482_v25 = vld [vmem:[#allocation7 + $0x138] sm:$0xff] (%p2770_p12)  ;;  %v479_v26 = vld [vmem:[#allocation7 + $0x120] sm:$0xff] (%p2770_p12) }
 0x225   :  { %1335 = vmatprep.subr.bf16.mxu0 (%p2770_p12), %v1334_v52  ;;  %v696_v32 = vld [vmem:[#allocation10 + $0x8] sm:$0xff] (%p2770_p12)  ;;  %v698_v33 = vld [vmem:[#allocation10 + $0x18] sm:$0xff] (%p2770_p12)  ;;  %v695_v34 = vld [vmem:[#allocation10] sm:$0xff] (%p2770_p12) }
 0x226   : > { %v406_v29 = vrot.slane %v399_v27, %v405_v23  ;;  %193 = sbr.rel (!%p2770_p12) target bundleno = 268 (0x10c), region = 138  ;;  %v1418_v35 = vpack.c.bf16 (%p2770_p12), %v698_v33, %v696_v32  ;;  %v697_v36 = vld [vmem:[#allocation10 + $0x10] sm:$0xff] (%p2770_p12)  ;;  %v700_v37 = vld [vmem:[#allocation10 + $0x28] sm:$0xff] (%p2770_p12)  ;;  %v702_v38 = vld [vmem:[#allocation10 + $0x38] sm:$0xff] (%p2770_p12) }
 0x227   :  { %v1420_v39 = vpack.c.bf16 (%p2770_p12), %v697_v36, %v695_v34  ;;  %v1422_v40 = vpack.c.bf16 (%p2770_p12), %v702_v38, %v700_v37  ;;  %v699_v41 = vld [vmem:[#allocation10 + $0x20] sm:$0xff] (%p2770_p12)  ;;  %v701_v42 = vld [vmem:[#allocation10 + $0x30] sm:$0xff] (%p2770_p12)  ;;  %v704_v43 = vld [vmem:[#allocation10 + $0x48] sm:$0xff] (%p2770_p12) }
 0x228   : > { %v414_v30 = vcombine.low %v406_v29, %v413_v28  ;;  %1337 = vmatpush1.bf16.msra.mxu0 (%p2770_p12), %v1336_v57  ;;  %v481_v28 = vld [vmem:[#allocation7 + $0x130] sm:$0xff] (%p2770_p12)  ;;  %v484_v29 = vld [vmem:[#allocation7 + $0x148] sm:$0xff] (%p2770_p12)  ;;  %1419 = vmatprep.subr.bf16.mxu1 (%p2770_p12), %v1418_v35  ;;  %v706_v45 = vld [vmem:[#allocation10 + $0x58] sm:$0xff] (%p2770_p12)  ;;  %v1424_v50 = vpack.c.bf16 (%p2770_p12), %v701_v42, %v699_v41 }
 0x229   :  { %1339 = vmatprep.subr.bf16.mxu0 (%p2770_p12), %v1338_v58  ;;  %v1360_v44 = vpack.c.bf16 (%p2770_p12), %v481_v28, %v479_v26  ;;  %v483_v47 = vld [vmem:[#allocation7 + $0x140] sm:$0xff] (%p2770_p12)  ;;  %v485_v48 = vld [vmem:[#allocation7 + $0x150] sm:$0xff] (%p2770_p12)  ;;  %v488_v49 = vld [vmem:[#allocation7 + $0x168] sm:$0xff] (%p2770_p12)  ;;  %1421 = vmatpush1.bf16.msra.mxu1 (%p2770_p12), %v1420_v39  ;;  %v1426_v52 = vpack.c.bf16 (%p2770_p12), %v706_v45, %v704_v43 }
 0x22a   : > { %v421_v31 = vrot.slane %v414_v30, %v405_v23  ;;  %v477_v23 = vld [vmem:[#allocation7 + $0x110] sm:$0xff] (%p2770_p12)  ;;  %v486_v30 = vld [vmem:[#allocation7 + $0x158] sm:$0xff] (%p2770_p12)  ;;  %1423 = vmatprep.subr.bf16.mxu1 (%p2770_p12), %v1422_v40  ;;  %v703_v53 = vld [vmem:[#allocation10 + $0x40] sm:$0xff] (%p2770_p12)  ;;  %v1364_v57 = vpack.c.bf16 (%p2770_p12), %v485_v48, %v483_v47 }
 0x22b   :  { %v1356_v27 = vpack.c.bf16 (%p2770_p12), %v477_v23, %v475_v22  ;;  %v1362_v46 = vpack.c.bf16 (%p2770_p12), %v486_v30, %v484_v29  ;;  %v490_v51 = vld [vmem:[#allocation7 + $0x178] sm:$0xff] (%p2770_p12)  ;;  %v705_v54 = vld [vmem:[#allocation10 + $0x50] sm:$0xff] (%p2770_p12)  ;;  %v708_v55 = vld [vmem:[#allocation10 + $0x68] sm:$0xff] (%p2770_p12) }
 0x22c   : > { %435 = vst.msk [vmem:[%s434_s27] ss:$8 sm:$0x7] %vm425_vm0, %v421_v31  ;;  %1341 = vmatpush1.bf16.msra.mxu0 (%p2770_p12), %v1340_v63  ;;  %v1358_v31 = vpack.c.bf16 (%p2770_p12), %v482_v25, %v480_v24  ;;  %v710_v56 = vld [vmem:[#allocation10 + $0x78] sm:$0xff] (%p2770_p12)  ;;  %v1366_v58 = vpack.c.bf16 (%p2770_p12), %v490_v51, %v488_v49  ;;  %v487_v59 = vld [vmem:[#allocation7 + $0x160] sm:$0xff] (%p2770_p12)  ;;  %v489_v60 = vld [vmem:[#allocation7 + $0x170] sm:$0xff] (%p2770_p12)  ;;  %v1428_v62 = vpack.c.bf16 (%p2770_p12), %v705_v54, %v703_v53 }
 0x22d   :  { %1343 = vmatprep.subr.bf16.mxu0 %v1342_v0  ;;  %v492_v61 = vld [vmem:[#allocation7 + $0x188] sm:$0xff]  ;;  %1425 = vmatpush1.bf16.msra.mxu1 %v1424_v50  ;;  %v494_v63 = vld [vmem:[#allocation7 + $0x198] sm:$0xff]  ;;  %v1430_v0 = vpack.c.bf16 %v710_v56, %v708_v55  ;;  %v707_v1 = vld [vmem:[#allocation10 + $0x60] sm:$0xff] }
 0x22e   :  { %1427 = vmatprep.subr.bf16.mxu1 %v1426_v52  ;;  %v709_v2 = vld [vmem:[#allocation10 + $0x70] sm:$0xff]  ;;  %v712_v3 = vld [vmem:[#allocation10 + $0x88] sm:$0xff]  ;;  %v714_v4 = vld [vmem:[#allocation10 + $0x98] sm:$0xff] }
 0x22f   :  { %v491_v7 = vld [vmem:[#allocation7 + $0x180] sm:$0xff]  ;;  %v493_v8 = vld [vmem:[#allocation7 + $0x190] sm:$0xff]  ;;  %v1432_v10 = vpack.c.bf16 %v709_v2, %v707_v1  ;;  %v498_v11 = vld [vmem:[#allocation7 + $0x1b8] sm:$0xff] }
 0x230   :  { %1345 = vmatpush1.bf16.msra.mxu0 %v1344_v5  ;;  %v1368_v5 = vpack.c.bf16 %v489_v60, %v487_v59  ;;  %v716_v16 = vld [vmem:[#allocation10 + $0xa8] sm:$0xff]  ;;  %v718_v17 = vld [vmem:[#allocation10 + $0xb8] sm:$0xff]  ;;  %v1372_v18 = vpack.c.bf16 %v493_v8, %v491_v7  ;;  %v715_v26 = vld [vmem:[#allocation10 + $0xa0] sm:$0xff] }
 0x231   :  { %1347 = vmatprep.subr.bf16.mxu0 %v1346_v6  ;;  %v1370_v6 = vpack.c.bf16 %v494_v63, %v492_v61  ;;  %1429 = vmatpush1.bf16.msra.mxu1 %v1428_v62  ;;  %v500_v22 = vld [vmem:[#allocation7 + $0x1c8] sm:$0xff]  ;;  %v502_v24 = vld [vmem:[#allocation7 + $0x1d8] sm:$0xff]  ;;  %v1438_v25 = vpack.c.bf16 %v718_v17, %v716_v16  ;;  %v499_v32 = vld [vmem:[#allocation7 + $0x1c0] sm:$0xff] }
 0x232   :  { %1431 = vmatprep.subr.bf16.mxu1 %v1430_v0  ;;  %v720_v28 = vld [vmem:[#allocation10 + $0xc8] sm:$0xff]  ;;  %v722_v29 = vld [vmem:[#allocation10 + $0xd8] sm:$0xff]  ;;  %v501_v33 = vld [vmem:[#allocation7 + $0x1d0] sm:$0xff] }
 0x233   :  { %v438_v9 = vld [vmem:[#allocation4 + $0x8] sm:$0xff]  ;;  %v504_v34 = vld [vmem:[#allocation7 + $0x1e8] sm:$0xff]  ;;  %v506_v36 = vld [vmem:[#allocation7 + $0x1f8] sm:$0xff]  ;;  %v1442_v37 = vpack.c.bf16 %v722_v29, %v720_v28  ;;  %v1380_v42 = vpack.c.bf16 %v501_v33, %v499_v32 }
 0x234   :  { %v441_v13 = vmul.f32 0.125, %v438_v9  ;;  %1349 = vmatpush1.bf16.msra.mxu0 %v1348_v14  ;;  %v496_v9 = vld [vmem:[#allocation7 + $0x1a8] sm:$0xff]  ;;  %v711_v14 = vld [vmem:[#allocation10 + $0x80] sm:$0xff]  ;;  %v721_v39 = vld [vmem:[#allocation10 + $0xd0] sm:$0xff]  ;;  %v1382_v43 = vpack.c.bf16 %v506_v36, %v504_v34 }
 0x235   :  { %1351 = vmatprep.subr.bf16.mxu0 %v1350_v15  ;;  %v713_v15 = vld [vmem:[#allocation10 + $0x90] sm:$0xff]  ;;  %v1374_v19 = vpack.c.bf16 %v498_v11, %v496_v9  ;;  %1433 = vmatpush1.bf16.msra.mxu1 %v1432_v10  ;;  %v719_v38 = vld [vmem:[#allocation10 + $0xc0] sm:$0xff]  ;;  %v724_v40 = vld [vmem:[#allocation10 + $0xe8] sm:$0xff] }
 0x236   :  { %615 = vmatprep.mubr.f32.mxu0 %v441_v13  ;;  %v1434_v13 = vpack.c.bf16 %v714_v4, %v712_v3  ;;  %v1436_v23 = vpack.c.bf16 %v713_v15, %v711_v14  ;;  %v726_v41 = vld [vmem:[#allocation10 + $0xf8] sm:$0xff]  ;;  %v505_v45 = vld [vmem:[#allocation7 + $0x1f0] sm:$0xff]  ;;  %v1444_v47 = vpack.c.bf16 %v721_v39, %v719_v38  ;;  %v723_v50 = vld [vmem:[#allocation10 + $0xe0] sm:$0xff] }
 0x237   :  { %v510_v48 = vld [vmem:[#allocation7 + $0x218] sm:$0xff]  ;;  %v1446_v49 = vpack.c.bf16 %v726_v41, %v724_v40  ;;  %v725_v51 = vld [vmem:[#allocation10 + $0xf0] sm:$0xff]  ;;  %v728_v52 = vld [vmem:[#allocation10 + $0x108] sm:$0xff] }
 0x238   :  { %1353 = vmatpush1.bf16.msra.mxu0 %v1352_v20  ;;  %v495_v20 = vld [vmem:[#allocation7 + $0x1a0] sm:$0xff]  ;;  %1435 = vmatprep.subr.bf16.mxu1 %v1434_v13  ;;  %v730_v53 = vld [vmem:[#allocation10 + $0x118] sm:$0xff]  ;;  %v437_v55 = vld [vmem:[#allocation4] sm:$0xff]  ;;  %v1448_v60 = vpack.c.bf16 %v725_v51, %v723_v50 }
 0x239   :  { %1355 = vmatprep.subr.bf16.mxu0 %v1354_v21  ;;  %v497_v21 = vld [vmem:[#allocation7 + $0x1b0] sm:$0xff]  ;;  %1437 = vmatpush1.bf16.msra.mxu1 %v1436_v23  ;;  %v512_v59 = vld [vmem:[#allocation7 + $0x228] sm:$0xff]  ;;  %v514_v61 = vld [vmem:[#allocation7 + $0x238] sm:$0xff]  ;;  %v1450_v62 = vpack.c.bf16 %v730_v53, %v728_v52  ;;  %v440_v1 = vmul.f32 0.125, %v437_v55 }
 0x23a   :  { %v1376_v30 = vpack.c.bf16 %v497_v21, %v495_v20  ;;  %1439 = vmatprep.subr.bf16.mxu1 %v1438_v25  ;;  %v727_v63 = vld [vmem:[#allocation10 + $0x100] sm:$0xff]  ;;  %v729_v0 = vld [vmem:[#allocation10 + $0x110] sm:$0xff]  ;;  %v732_v2 = vld [vmem:[#allocation10 + $0x128] sm:$0xff] }
 0x23b   :  { %v734_v3 = vld [vmem:[#allocation10 + $0x138] sm:$0xff]  ;;  %v513_v7 = vld [vmem:[#allocation7 + $0x230] sm:$0xff]  ;;  %v516_v8 = vld [vmem:[#allocation7 + $0x248] sm:$0xff]  ;;  %v1452_v9 = vpack.c.bf16 %v729_v0, %v727_v63 }
 0x23c   :  { %1357 = vmatpush1.bf16.msra.mxu0 %v1356_v27  ;;  %v717_v27 = vld [vmem:[#allocation10 + $0xb0] sm:$0xff]  ;;  %v518_v10 = vld [vmem:[#allocation7 + $0x258] sm:$0xff]  ;;  %v1454_v11 = vpack.c.bf16 %v734_v3, %v732_v2  ;;  %v731_v13 = vld [vmem:[#allocation10 + $0x120] sm:$0xff] }
 0x23d   :  { %1359 = vmatprep.subr.bf16.mxu0 %v1358_v31  ;;  %v1378_v31 = vpack.c.bf16 %v502_v24, %v500_v22  ;;  %v1440_v35 = vpack.c.bf16 %v717_v27, %v715_v26  ;;  %v733_v14 = vld [vmem:[#allocation10 + $0x130] sm:$0xff]  ;;  %v736_v15 = vld [vmem:[#allocation10 + $0x148] sm:$0xff]  ;;  %v738_v16 = vld [vmem:[#allocation10 + $0x158] sm:$0xff] }
 0x23e   :  { %v515_v20 = vld [vmem:[#allocation7 + $0x240] sm:$0xff]  ;;  %v517_v21 = vld [vmem:[#allocation7 + $0x250] sm:$0xff]  ;;  %v520_v22 = vld [vmem:[#allocation7 + $0x268] sm:$0xff]  ;;  %v1456_v23 = vpack.c.bf16 %v733_v14, %v731_v13  ;;  %v1458_v25 = vpack.c.bf16 %v738_v16, %v736_v15 }
 0x23f   :  { %1441 = vmatpush1.bf16.msra.mxu1 %v1440_v35  ;;  %v522_v24 = vld [vmem:[#allocation7 + $0x278] sm:$0xff]  ;;  %v735_v26 = vld [vmem:[#allocation10 + $0x140] sm:$0xff]  ;;  %v737_v27 = vld [vmem:[#allocation10 + $0x150] sm:$0xff] }
 0x240   :  { %1361 = vmatpush1.bf16.msra.mxu0 %v1360_v44  ;;  %v503_v44 = vld [vmem:[#allocation7 + $0x1e0] sm:$0xff]  ;;  %1443 = vmatprep.subr.bf16.mxu1 %v1442_v37  ;;  %v740_v28 = vld [vmem:[#allocation10 + $0x168] sm:$0xff]  ;;  %v742_v29 = vld [vmem:[#allocation10 + $0x178] sm:$0xff]  ;;  %v1460_v35 = vpack.c.bf16 %v737_v27, %v735_v26 }
 0x241   :  { %1363 = vmatprep.subr.bf16.mxu0 %v1362_v46  ;;  %v508_v46 = vld [vmem:[#allocation7 + $0x208] sm:$0xff]  ;;  %v1384_v54 = vpack.c.bf16 %v505_v45, %v503_v44  ;;  %v519_v32 = vld [vmem:[#allocation7 + $0x260] sm:$0xff]  ;;  %v521_v33 = vld [vmem:[#allocation7 + $0x270] sm:$0xff]  ;;  %v1462_v37 = vpack.c.bf16 %v742_v29, %v740_v28 }
 0x242   :  { %v1386_v56 = vpack.c.bf16 %v510_v48, %v508_v46  ;;  %v524_v34 = vld [vmem:[#allocation7 + $0x288] sm:$0xff]  ;;  %v526_v36 = vld [vmem:[#allocation7 + $0x298] sm:$0xff]  ;;  %v739_v38 = vld [vmem:[#allocation10 + $0x160] sm:$0xff] }
 0x243   :  { %1445 = vmatpush1.bf16.msra.mxu1 %v1444_v47  ;;  %v741_v39 = vld [vmem:[#allocation10 + $0x170] sm:$0xff]  ;;  %v744_v40 = vld [vmem:[#allocation10 + $0x188] sm:$0xff]  ;;  %v746_v41 = vld [vmem:[#allocation10 + $0x198] sm:$0xff] }
 0x244   :  { %1365 = vmatpush1.bf16.msra.mxu0 %v1364_v57  ;;  %v507_v57 = vld [vmem:[#allocation7 + $0x200] sm:$0xff]  ;;  %1447 = vmatprep.subr.bf16.mxu1 %v1446_v49  ;;  %v525_v45 = vld [vmem:[#allocation7 + $0x290] sm:$0xff]  ;;  %v528_v46 = vld [vmem:[#allocation7 + $0x2a8] sm:$0xff]  ;;  %v1464_v47 = vpack.c.bf16 %v741_v39, %v739_v38  ;;  %v1466_v49 = vpack.c.bf16 %v746_v41, %v744_v40 }
 0x245   :  { %1367 = vmatprep.subr.bf16.mxu0 %v1366_v58  ;;  %v509_v58 = vld [vmem:[#allocation7 + $0x210] sm:$0xff]  ;;  %v523_v44 = vld [vmem:[#allocation7 + $0x280] sm:$0xff]  ;;  %v530_v48 = vld [vmem:[#allocation7 + $0x2b8] sm:$0xff] }
 0x246   :  { %v1388_v4 = vpack.c.bf16 %v509_v58, %v507_v57  ;;  %v743_v50 = vld [vmem:[#allocation10 + $0x180] sm:$0xff]  ;;  %v745_v51 = vld [vmem:[#allocation10 + $0x190] sm:$0xff]  ;;  %v748_v52 = vld [vmem:[#allocation10 + $0x1a8] sm:$0xff]  ;;  %v1406_v55 = vpack.c.bf16 %v530_v48, %v528_v46 }
 0x247   :  { %1449 = vmatpush1.bf16.msra.mxu1 %v1448_v60  ;;  %v750_v53 = vld [vmem:[#allocation10 + $0x1b8] sm:$0xff]  ;;  %v529_v57 = vld [vmem:[#allocation7 + $0x2b0] sm:$0xff]  ;;  %v532_v58 = vld [vmem:[#allocation7 + $0x2c8] sm:$0xff] }
 0x248   :  { %1369 = vmatpush1.bf16.msra.mxu0 %v1368_v5  ;;  %v1390_v5 = vpack.c.bf16 %v514_v61, %v512_v59  ;;  %1451 = vmatprep.subr.bf16.mxu1 %v1450_v62  ;;  %v1468_v59 = vpack.c.bf16 %v745_v51, %v743_v50  ;;  %v534_v60 = vld [vmem:[#allocation7 + $0x2d8] sm:$0xff]  ;;  %v1470_v61 = vpack.c.bf16 %v750_v53, %v748_v52  ;;  %v747_v62 = vld [vmem:[#allocation10 + $0x1a0] sm:$0xff]  ;;  %v749_v63 = vld [vmem:[#allocation10 + $0x1b0] sm:$0xff] }
 0x249   :  { %1371 = vmatprep.subr.bf16.mxu0 %v1370_v6  ;;  %v511_v6 = vld [vmem:[#allocation7 + $0x220] sm:$0xff]  ;;  %v752_v0 = vld [vmem:[#allocation10 + $0x1c8] sm:$0xff]  ;;  %v1410_v3 = vpack.c.bf16 %v534_v60, %v532_v58  ;;  %v537_v14 = vld [vmem:[#allocation7 + $0x2f0] sm:$0xff] }
 0x24a   :  { %v1392_v17 = vpack.c.bf16 %v513_v7, %v511_v6  ;;  %v1472_v6 = vpack.c.bf16 %v749_v63, %v747_v62  ;;  %v536_v7 = vld [vmem:[#allocation7 + $0x2e8] sm:$0xff]  ;;  %v535_v13 = vld [vmem:[#allocation7 + $0x2e0] sm:$0xff]  ;;  %v439_v16 = vld [vmem:[#allocation4 + $0x10] sm:$0xff] }
 0x24b   :  { %1453 = vmatpush1.bf16.msra.mxu1 %v1452_v9  ;;  %v1416_v15 = vpack.c.bf16 %v537_v14, %v535_v13  ;;  %v860_v27 = vld [vmem:[#allocation12 + $0x80] sm:$0xff]  ;;  %v861_v28 = vld [vmem:[#allocation12 + $0x88] sm:$0xff]  ;;  %v862_v41 = vld [vmem:[#allocation12 + $0x90] sm:$0xff] }
 0x24c   :  { %1373 = vmatpush1.bf16.msra.mxu0 %v1372_v18  ;;  %v2140_v18 = vmov 0.0   ;;  %1455 = vmatprep.subr.bf16.mxu1 %v1454_v11  ;;  %v1482_v29 = vpack.c.bf16 %v861_v28, %v860_v27  ;;  %v844_v38 = vld [vmem:[#allocation12] sm:$0xff]  ;;  %v845_v39 = vld [vmem:[#allocation12 + $0x8] sm:$0xff]  ;;  %v847_v48 = vld [vmem:[#allocation12 + $0x18] sm:$0xff] }
 0x24d   :  { %1375 = vmatprep.subr.bf16.mxu0 %v1374_v19  ;;  %v1394_v19 = vpack.c.bf16 %v518_v10, %v516_v8  ;;  %v538_v8 = vld [vmem:[#allocation7 + $0x2f8] sm:$0xff]  ;;  %v865_v50 = vld [vmem:[#allocation12 + $0xa8] sm:$0xff]  ;;  %v848_v53 = vld [vmem:[#allocation12 + $0x20] sm:$0xff] }
 0x24e   :  { %v1414_v11 = vpack.c.bf16 %v538_v8, %v536_v7  ;;  %v851_v60 = vld [vmem:[#allocation12 + $0x38] sm:$0xff]  ;;  %v869_v62 = vld [vmem:[#allocation12 + $0xc8] sm:$0xff]  ;;  %v854_v7 = vld [vmem:[#allocation12 + $0x50] sm:$0xff] }
 0x24f   :  { %1457 = vmatpush1.bf16.msra.mxu1 %v1456_v23  ;;  %v855_v8 = vld [vmem:[#allocation12 + $0x58] sm:$0xff]  ;;  %v856_v14 = vld [vmem:[#allocation12 + $0x60] sm:$0xff] }
 0x250   :  { %1377 = vmatpush1.bf16.msra.mxu0 %v1376_v30  ;;  %v1396_v30 = vpack.c.bf16 %v517_v21, %v515_v20  ;;  %1459 = vmatprep.subr.bf16.mxu1 %v1458_v25  ;;  %v756_v21 = vld [vmem:[#allocation10 + $0x1e8] sm:$0xff]  ;;  %v757_v25 = vld [vmem:[#allocation10 + $0x1f0] sm:$0xff] }
 0x251   :  { %1379 = vmatprep.subr.bf16.mxu0 %v1378_v31  ;;  %v1398_v31 = vpack.c.bf16 %v522_v24, %v520_v22  ;;  %v758_v22 = vld [vmem:[#allocation10 + $0x1f8] sm:$0xff]  ;;  %v755_v24 = vld [vmem:[#allocation10 + $0x1e0] sm:$0xff] }
 0x252   :  { %v1478_v23 = vpack.c.bf16 %v758_v22, %v756_v21  ;;  %v1480_v26 = vpack.c.bf16 %v757_v25, %v755_v24  ;;  %v859_v21 = vld [vmem:[#allocation12 + $0x78] sm:$0xff] }
 0x253   :  { %1461 = vmatpush1.bf16.msra.mxu1 %v1460_v35 }
 0x254   :  { %1381 = vmatpush1.bf16.msra.mxu0 %v1380_v42  ;;  %v1400_v42 = vpack.c.bf16 %v521_v33, %v519_v32  ;;  %1463 = vmatprep.subr.bf16.mxu1 %v1462_v37  ;;  %v547_v32 = vsub.s32 1, %v2707_v12 }
 0x255   :  { %1383 = vmatprep.subr.bf16.mxu0 %v1382_v43  ;;  %v1402_v43 = vpack.c.bf16 %v526_v36, %v524_v34 }
 0x257   :  { %1465 = vmatpush1.bf16.msra.mxu1 %v1464_v47  ;;  %v846_v47 = vld [vmem:[#allocation12 + $0x10] sm:$0xff] }
 0x258   :  { %1385 = vmatpush1.bf16.msra.mxu0 %v1384_v54  ;;  %v1404_v54 = vpack.c.bf16 %v525_v45, %v523_v44  ;;  %1467 = vmatprep.subr.bf16.mxu1 %v1466_v49  ;;  %v1484_v44 = vpack.c.bf16 %v845_v39, %v844_v38  ;;  %v864_v49 = vld [vmem:[#allocation12 + $0xa0] sm:$0xff]  ;;  %v1488_v51 = vpack.c.bf16 %v847_v48, %v846_v47 }
 0x259   :  { %1387 = vmatprep.subr.bf16.mxu0 %v1386_v56  ;;  %v527_v56 = vld [vmem:[#allocation7 + $0x2a0] sm:$0xff]  ;;  %v1490_v52 = vpack.c.bf16 %v865_v50, %v864_v49 }
 0x25a   :  { %v1408_v2 = vpack.c.bf16 %v529_v57, %v527_v56  ;;  %v867_v56 = vld [vmem:[#allocation12 + $0xb8] sm:$0xff] }
 0x25b   :  { %616 = vmatmul.mubr.f32.vlgmr.msra.gmra.mrb[0].mxu0 %v440_v1  ;;  %v754_v1 = vld [vmem:[#allocation10 + $0x1d8] sm:$0xff]  ;;  %1469 = vmatpush1.bf16.msra.mxu1 %v1468_v59  ;;  %v850_v59 = vld [vmem:[#allocation12 + $0x30] sm:$0xff] }
 0x25c   :  { %1389 = vmatpush1.bf16.msra.mxu0 %v1388_v4  ;;  %686 = vmatprep.mubr.f32.mxu0 %v2140_v18  ;;  %v531_v4 = vld [vmem:[#allocation7 + $0x2c0] sm:$0xff]  ;;  %v1474_v9 = vpack.c.bf16 %v754_v1, %v752_v0  ;;  %v1496_v63 = vpack.c.bf16 %v851_v60, %v850_v59 }
 0x25d   :  { %1391 = vmatprep.subr.bf16.mxu0 %v1390_v5  ;;  %v533_v5 = vld [vmem:[#allocation7 + $0x2d0] sm:$0xff]  ;;  %1471 = vmatprep.subr.bf16.mxu1 %v1470_v61  ;;  %v751_v18 = vld [vmem:[#allocation10 + $0x1c0] sm:$0xff] }
 0x25e   :  { %v1412_v10 = vpack.c.bf16 %v533_v5, %v531_v4  ;;  %v868_v61 = vld [vmem:[#allocation12 + $0xc0] sm:$0xff]  ;;  %v871_v4 = vld [vmem:[#allocation12 + $0xd8] sm:$0xff] }
 0x25f   :  { %1473 = vmatpush1.bf16.msra.mxu1 %v1472_v6  ;;  %v1498_v0 = vpack.c.bf16 %v869_v62, %v868_v61  ;;  %v852_v1 = vld [vmem:[#allocation12 + $0x40] sm:$0xff] }
 0x260   :  { %1393 = vmatpush1.bf16.msra.mxu0 %v1392_v17  ;;  %1475 = vmatprep.subr.bf16.mxu1 %v1474_v9  ;;  %v442_v17 = vmul.f32 0.125, %v439_v16  ;;  %v872_v9 = vld [vmem:[#allocation12 + $0xe0] sm:$0xff] }
 0x261   :  { %1395 = vmatprep.subr.bf16.mxu0 %v1394_v19  ;;  %v753_v19 = vld [vmem:[#allocation10 + $0x1d0] sm:$0xff] }
 0x262   :  { %v1476_v20 = vpack.c.bf16 %v753_v19, %v751_v18  ;;  %v875_v18 = vld [vmem:[#allocation12 + $0xf8] sm:$0xff] }
 0x264   :  { %1397 = vmatpush1.bf16.msra.mxu0 %v1396_v30  ;;  %1477 = vmatpush1.bf16.msra.mxu1 %v1476_v20  ;;  %v543_v30 = vsub.s32 0, %v2707_v12  ;;  %v858_v20 = vld [vmem:[#allocation12 + $0x70] sm:$0xff] }
 0x265   :  { %1399 = vmatprep.subr.bf16.mxu0 %v1398_v31  ;;  %1479 = vmatprep.subr.bf16.mxu1 %v1478_v23  ;;  %v539_v31 = vld [vmem:[%s2771_s14] sm:$0x3]  ;;  %v1512_v22 = vpack.c.bf16 %v859_v21, %v858_v20 }
 0x266   :  { %v544_v33 = vrot.slane %v539_v31, %v543_v30  ;;  %v548_v34 = vrot.slane %v539_v31, %v547_v32  ;;  %v759_v23 = vld [vmem:[%s2772_s29] sm:$0x3] }
 0x267   :  { %v764_v24 = vrot.slane %v759_v23, %v543_v30  ;;  %v768_v25 = vrot.slane %v759_v23, %v547_v32 }
 0x268   :  { %1401 = vmatpush1.bf16.msra.mxu0 %v1400_v42  ;;  %1481 = vmatpush1.bf16.msra.mxu1 %v1480_v26  ;;  %v863_v42 = vld [vmem:[#allocation12 + $0x98] sm:$0xff] }
 0x269   :  { %1403 = vmatprep.subr.bf16.mxu0 %v1402_v43  ;;  %1483 = vmatprep.subr.bf16.mxu1 %v1482_v29  ;;  %v1486_v46 = vpack.c.bf16 %v863_v42, %v862_v41 }
 0x26c   :  { %1405 = vmatpush1.bf16.msra.mxu0 %v1404_v54  ;;  %v849_v54 = vld [vmem:[#allocation12 + $0x28] sm:$0xff] }
 0x26d   :  { %1407 = vmatprep.subr.bf16.mxu0 %v1406_v55  ;;  %v866_v55 = vld [vmem:[#allocation12 + $0xb0] sm:$0xff]  ;;  %v1492_v57 = vpack.c.bf16 %v849_v54, %v848_v53 }
 0x26e   :  { %v1494_v58 = vpack.c.bf16 %v867_v56, %v866_v55 }
 0x270   :  { %1409 = vmatpush1.bf16.msra.mxu0 %v1408_v2  ;;  %v853_v2 = vld [vmem:[#allocation12 + $0x48] sm:$0xff] }
 0x271   :  { %1411 = vmatprep.subr.bf16.mxu0 %v1410_v3  ;;  %v870_v3 = vld [vmem:[#allocation12 + $0xd0] sm:$0xff]  ;;  %v1500_v5 = vpack.c.bf16 %v853_v2, %v852_v1 }
 0x272   :  { %v1502_v6 = vpack.c.bf16 %v871_v4, %v870_v3 }
 0x274   :  { %1413 = vmatpush1.bf16.msra.mxu0 %v1412_v10  ;;  %v873_v10 = vld [vmem:[#allocation12 + $0xe8] sm:$0xff] }
 0x275   :  { %1415 = vmatprep.subr.bf16.mxu0 %v1414_v11  ;;  %v1504_v11 = vpack.c.bf16 %v855_v8, %v854_v7  ;;  %v1506_v13 = vpack.c.bf16 %v873_v10, %v872_v9 }
 0x278   :  { %1417 = vmatpush1.bf16.msra.mxu0 %v1416_v15  ;;  %v857_v15 = vld [vmem:[#allocation12 + $0x68] sm:$0xff] }
 0x279   :  { %v1508_v16 = vpack.c.bf16 %v857_v15, %v856_v14 }
 0x27b   :  { %687 = vmatmul.mubr.f32.vlgmr.msra.gmra.mrb[0].mxu0 %v442_v17  ;;  %v874_v17 = vld [vmem:[#allocation12 + $0xf0] sm:$0xff] }
 0x27c   :  { %v1510_v19 = vpack.c.bf16 %v875_v18, %v874_v17 }
 0x34e   :  { %v688_v35 = vpop.f32.mrb[0].mxu0 }
 0x34f   :  { %v1514_v36 = vadd.f32 %v688_v35, %v544_v33  ;;  %v690_v37 = vpop.f32.mrb[1].mxu0 }
 0x350   :  { %v1515_v40 = vadd.f32 %v690_v37, %v548_v34 }
 0x351   :  { %v693_v45 = vmax.f32 %v1514_v36, 0.0  ;;  %v1267_v36 = vld [vmem:[%s2773_s20] ss:$0 sm:$0xff] }
 0x352   :  { %v694_v43 = vmax.f32 %v1515_v40, 0.0 }
 0x354   :  { %835 = vmatprep.mubr.f32.mxu1 %v694_v43 }
 0x355   :  { %836 = vmatmul.mubr.f32.vlgmr.msra.gmra.mrb[0].mxu1 %v693_v45 }
 0x356   :  { %1485 = vmatpush3.bf16.msra.mxu1 %v1484_v44 }
 0x357   :  { %1487 = vmatprep.subr.bf16.mxu1 %v1486_v46 }
 0x35a   :  { %1489 = vmatpush3.bf16.msra.mxu1 %v1488_v51 }
 0x35b   :  { %1491 = vmatprep.subr.bf16.mxu1 %v1490_v52 }
 0x35e   :  { %1493 = vmatpush3.bf16.msra.mxu1 %v1492_v57 }
 0x35f   :  { %1495 = vmatprep.subr.bf16.mxu1 %v1494_v58 }
 0x362   :  { %1497 = vmatpush3.bf16.msra.mxu1 %v1496_v63 }
 0x363   :  { %1499 = vmatprep.subr.bf16.mxu1 %v1498_v0 }
 0x366   :  { %1501 = vmatpush3.bf16.msra.mxu1 %v1500_v5 }
 0x367   :  { %1503 = vmatprep.subr.bf16.mxu1 %v1502_v6 }
 0x36a   :  { %1505 = vmatpush3.bf16.msra.mxu1 %v1504_v11 }
 0x36b   :  { %1507 = vmatprep.subr.bf16.mxu1 %v1506_v13 }
 0x36e   :  { %1509 = vmatpush3.bf16.msra.mxu1 %v1508_v16 }
 0x36f   :  { %1511 = vmatprep.subr.bf16.mxu1 %v1510_v19 }
 0x372   :  { %1513 = vmatpush3.bf16.msra.mxu1 %v1512_v22 }
 0x428   :  { %v837_v26 = vpop.f32.mrb[0].mxu1 }
 0x429   :  { %v838_v27 = vadd.f32 %v837_v26, %v764_v24  ;;  %v839_v28 = vpop.f32.mrb[1].mxu1 }
 0x42a   :  { %v840_v29 = vadd.f32 %v839_v28, %v768_v25 }
 0x42b   :  { %v842_v33 = vmax.f32 %v838_v27, 0.0 }
 0x42c   :  { %v843_v31 = vmax.f32 %v840_v29, 0.0 }
 0x42e   :  { %947 = vmatprep.mubr.f32.mxu1 %v843_v31 }
 0x42f   :  { %948 = vmatmul.mubr.f32.vlgmr.msra.gmra.mrb[2].mxu1 %v842_v33 }
 0x502   :  { %v1319_v34 = vpop.f32.mrb[2].mxu1 }
 0x503   :  { %v1320_v35 = vpop.f32.mrb[3].mxu1 }
 0x504   :  { %v1321_v30 = vadd.f32 %v1320_v35, %v1319_v34 }
 0x506   :  { %v950_v37 = vadd.f32 %v1321_v30, %v1267_v36 }
 0x508   :  { %953 = vst [vmem:[#allocation13] sm:$0xff] %v950_v37 }
 0x509   :  { %2077 = shalt.err (!%p2074_p0)
}
 0x50a   :  { %s2774_s28 = sld [smem:[#allocation53_spill]] }
 0x510   :  { %s2078_s22 = scalar_lea.hbm %s2774_s28, 128 }
 0x511   :  { %p2079_p11 = scmp.ne.s32.totalorder %s2774_s28, %s2078_s22  ;;  %p2082_p3 = scmp.lt.u32.totalorder %s2078_s22, %s2774_s28 }
 0x513   :  { %p2084_p1 = pnand %p2082_p3, %p2079_p11 }
 0x515   :  { %2087 = shalt.err (!%p2084_p1)
}
 0x516   :  { %963 = dma.vmem_to_hbm [thread:$0]  %s961_s17, 128, %s2774_s28, [#allocation9]  }
 0x517   :  { %2114 = dma.done.wait [#allocation9], 128  }
 0x518   :  { %2115 = vsyncadd [#allocation9], 4294967168 }
 0x519   :  { %967 = vsyncpa [#allocation8], 1 }
 0x51a   :  { %968 = vsyncpa [#allocation11], 1 }
 0x51b   :  { %969 = vsyncpa [#allocation9], 1 }
 0x51c   :  { %970 = vsyncmov [#allocation3] }
 0x51f   :  { %s971_s2 = vpop.sfrf %970 }
 0x520   :  { %p1268_p4 = scmp.ne.s32.totalorder %s971_s2, 0 }
 0x522   :  { %975 = shalt.err (%p1268_p4)  }
 0x523   :  { %977 = vsyncmov [#allocation3 + $0x1] }
 0x526   :  { %s978_s23 = vpop.sfrf %977 }
 0x527   :  { %p1269_p6 = scmp.ne.s32.totalorder %s978_s23, 0 }
 0x529   :  { %982 = shalt.err (%p1269_p6)  }
 0x52a   :  { %984 = vsyncmov [#allocation3 + $0x2] }
 0x52d   :  { %s985_s4 = vpop.sfrf %984 }
 0x52e   :  { %p1270_p5 = scmp.ne.s32.totalorder %s985_s4, 0 }
 0x530   :  { %989 = shalt.err (%p1270_p5)  }
 0x531   :  { %991 = vsyncmov [#allocation3 + $0x3] }
 0x534   :  { %s992_s5 = vpop.sfrf %991 }
 0x535   :  { %p1271_p7 = scmp.ne.s32.totalorder %s992_s5, 0 }
 0x537   :  { %996 = shalt.err (%p1271_p7)  }
 0x538   :  { %998 = vsyncmov [#allocation3 + $0x4] }
 0x53b   :  { %s999_s15 = vpop.sfrf %998 }
 0x53c   :  { %p1272_p9 = scmp.ne.s32.totalorder %s999_s15, 0 }
 0x53e   :  { %1003 = shalt.err (%p1272_p9)  }
 0x53f   :  { %1005 = vsyncmov [#allocation3 + $0x5] }
 0x542   :  { %s1006_s6 = vpop.sfrf %1005 }
 0x543   :  { %p1273_p12 = scmp.ne.s32.totalorder %s1006_s6, 0 }
 0x545   :  { %1010 = shalt.err (%p1273_p12)  }
 0x546   :  { %1012 = vsyncmov [#allocation3 + $0x6] }
 0x549   :  { %s1013_s8 = vpop.sfrf %1012 }
 0x54a   :  { %p1274_p8 = scmp.ne.s32.totalorder %s1013_s8, 0 }
 0x54c   :  { %1017 = shalt.err (%p1274_p8)  }
 0x54d   :  { %1019 = vsyncmov [#allocation3 + $0x7] }
 0x550   :  { %s1020_s30 = vpop.sfrf %1019 }
 0x551   :  { %p1275_p10 = scmp.ne.s32.totalorder %s1020_s30, 0 }
 0x553   :  { %1024 = shalt.err (%p1275_p10)  }
 0x554   :  { %1026 = vsyncmov [#allocation3 + $0x8] }
 0x557   :  { %s1027_s27 = vpop.sfrf %1026 }
 0x558   :  { %p1276_p13 = scmp.ne.s32.totalorder %s1027_s27, 0 }
 0x55a   :  { %1031 = shalt.err (%p1276_p13)  }
 0x55b   :  { %1033 = vsyncmov [#allocation3 + $0x9] }
 0x55e   :  { %s1034_s1 = vpop.sfrf %1033 }
 0x55f   :  { %p1277_p2 = scmp.ne.s32.totalorder %s1034_s1, 0 }
 0x561   :  { %1038 = shalt.err (%p1277_p2)  }
 0x562   :  { %1040 = vsyncmov [#allocation3 + $0xa] }
 0x565   :  { %s1041_s9 = vpop.sfrf %1040 }
 0x566   :  { %p1278_p0 = scmp.ne.s32.totalorder %s1041_s9, 0 }
 0x568   :  { %1045 = shalt.err (%p1278_p0)  }
 0x569   :  { %1047 = vsyncmov [#allocation3 + $0xb] }
 0x56c   :  { %s1048_s14 = vpop.sfrf %1047 }
 0x56d   :  { %p1279_p11 = scmp.ne.s32.totalorder %s1048_s14, 0 }
 0x56f   :  { %1052 = shalt.err (%p1279_p11)  }
 0x570   :  { %1054 = vsyncmov [#allocation3 + $0xc] }
 0x573   :  { %s1055_s16 = vpop.sfrf %1054 }
 0x574   :  { %p1280_p3 = scmp.ne.s32.totalorder %s1055_s16, 0 }
 0x576   :  { %1059 = shalt.err (%p1280_p3)  }
 0x577   :  { %1061 = vsyncmov [#allocation3 + $0xd] }
 0x57a   :  { %s1062_s21 = vpop.sfrf %1061 }
 0x57b   :  { %p1281_p1 = scmp.ne.s32.totalorder %s1062_s21, 0 }
 0x57d   :  { %1066 = shalt.err (%p1281_p1)  }
 0x57e   :  { %1068 = vsyncmov [#allocation3 + $0xe] }
 0x581   :  { %s1069_s29 = vpop.sfrf %1068 }
 0x582   :  { %p1282_p4 = scmp.ne.s32.totalorder %s1069_s29, 0 }
 0x584   :  { %1073 = shalt.err (%p1282_p4)  }
 0x585   :  { %1075 = vsyncmov [#allocation3 + $0xf] }
 0x588   :  { %s1076_s0 = vpop.sfrf %1075 }
 0x589   :  { %p1283_p6 = scmp.ne.s32.totalorder %s1076_s0, 0 }
 0x58b   :  { %1080 = shalt.err (%p1283_p6)  }

</bundles_post_ra>
